<compile_context>
chip_gen: v5e
topology: v5e:2x2
jax: 0.10.0
libtpu: 0.0.40
codegen_flags: <defaults>
</compile_context>

<pallas_src>
import functools

import jax
import jax.numpy as jnp
import numpy as np
from jax.experimental import pallas as pl
from jax.experimental.pallas import tpu as pltpu

NV = 778              # number of MANO vertices
NVP = 896             # NV padded up to a multiple of 128 (lane-aligned planes)
NJ = 16               # number of MANO joints (root + 5 fingers x 3)
NSHAPE = 10           # shape params
NPOSE = 15 * 9        # flattened finger pose feature
NFEAT = NSHAPE + NPOSE          # 145: merged [shape | pose_feature]
NCOEF = 12            # 3x4 used rows of each rigid transform (bottom row dropped)
VFLAT = NV * 3        # unpadded planar vertex width (for the raw buffers)
VFLATP = NVP * 3      # padded planar vertex width used inside the kernel

# NATURE joint order -> output joint order (same permutation as the torch module)
JOINT_REORDER = jnp.array(
    [0, 13, 14, 15, 16, 1, 2, 3, 17, 4, 5, 6, 18, 10, 11, 12, 19, 7, 8, 9, 20],
    dtype=jnp.int32)
EXTRA_TIPS_IDXS = jnp.array([745, 317, 444, 556, 673], dtype=jnp.int32)
# kintree parents: joints 1..15 are 5 fingers of 3-joint chains rooted at joint 0
KINTREE_TABLE = jnp.array([0, 0, 1, 2, 0, 4, 5, 0, 7, 8, 0, 10, 11, 0, 13, 14],
                          dtype=jnp.int32)


# ----------------------------------------------------------------------------
# Synthetic deterministic MANO parameters (shapes match the real buffers)
# ----------------------------------------------------------------------------
def make_mano_params(key):
    k1, k2, k3, k4, k5 = jax.random.split(key, 5)
    return dict(
        verts_template=0.1 * jax.random.normal(k1, (NV, 3), jnp.float32),
        shapedirs=0.01 * jax.random.normal(k2, (NV, 3, NSHAPE), jnp.float32),
        posedirs=0.01 * jax.random.normal(k3, (NPOSE, VFLAT), jnp.float32),
        J_regressor=jax.nn.softmax(
            jax.random.normal(k4, (NJ, NV), jnp.float32), axis=1),
        lbs_weights=jax.nn.softmax(
            2.0 * jax.random.normal(k5, (NV, NJ), jnp.float32), axis=1),
        kintree_table=KINTREE_TABLE,
        extra_tips_idxs=EXTRA_TIPS_IDXS,
    )


# ----------------------------------------------------------------------------
# Fused Pallas kernel: (shape+pose) blend  +  linear blend skinning.
#   Planar, lane-padded layout: columns of the blend output are
#   [x-plane(896) | y-plane(896) | z-plane(896)]  -> every slice / store is
#   lane-tile aligned and dense.  V_posed stays in VMEM (never hits HBM).
#   Skin transforms arrive as one [12*bt, 17] slab with rows ordered
#   (coefficient, batch-in-tile): each per-coefficient map mv_c is a free
#   contiguous sublane-block slice of the matmul result.
# ----------------------------------------------------------------------------
def _mano_fused_kernel(sp_ref, m_ref, tmpl_ref, bw_ref, w_ref, out_ref):
    bt = sp_ref.shape[0]
    # blend: template + [shape | pose_feature] @ [shapedirs ; posedirs]
    v_posed = tmpl_ref[...] + jnp.dot(
        sp_ref[...], bw_ref[...], preferred_element_type=jnp.float32)  # [bt, 3*NVP]
    x = v_posed[:, 0 * NVP:1 * NVP]     # lane-aligned plane slices (NVP % 128 == 0)
    y = v_posed[:, 1 * NVP:2 * NVP]
    z = v_posed[:, 2 * NVP:3 * NVP]
    # skinning: one wide matmul [12*bt, 17] @ [17, NVP]
    mv = jnp.dot(m_ref[...], w_ref[...],
                 preferred_element_type=jnp.float32)                   # [12*bt, NVP]

    def c(k):  # coefficient k: contiguous sublane-block slice (offset multiple of 8)
        return mv[k * bt:(k + 1) * bt, :]

    for i in range(3):
        # lane-dense [bt, NVP] row per output coordinate, single contiguous store
        out_ref[i, :, :] = (c(4 * i + 0) * x + c(4 * i + 1) * y
                            + c(4 * i + 2) * z + c(4 * i + 3))


def _mano_fused_pallas(sp, m_tiles, tmpl_row, blend_w, w_extT, bt, b_pad):
    n_tiles = b_pad // bt
    return pl.pallas_call(
        _mano_fused_kernel,
        out_shape=jax.ShapeDtypeStruct((3, b_pad, NVP), jnp.float32),
        grid=(n_tiles,),
        in_specs=[
            pl.BlockSpec((bt, NFEAT), lambda i: (i, 0)),
            pl.BlockSpec((NCOEF * bt, NJ + 1), lambda i: (i, 0)),
            # constant index_maps -> weights stay VMEM-resident across grid steps
            pl.BlockSpec((1, VFLATP), lambda i: (0, 0)),
            pl.BlockSpec((NFEAT, VFLATP), lambda i: (0, 0)),
            pl.BlockSpec((NJ + 1, NVP), lambda i: (0, 0)),
        ],
        out_specs=pl.BlockSpec((3, bt, NVP), lambda i: (0, i, 0)),
        compiler_params=pltpu.CompilerParams(
            dimension_semantics=("parallel",)),
    )(sp, m_tiles, tmpl_row, blend_w, w_extT)


# ----------------------------------------------------------------------------
# Plain-JAX glue
# ----------------------------------------------------------------------------
def _rotvec_to_rotmat(rotvec):
    """Rodrigues, identical to ManoBasic.batch_rotVec2Mat."""
    angle = jnp.linalg.norm(rotvec + 1e-8, axis=1, keepdims=True)      # [N,1]
    rot_dir = rotvec / (angle + 1e-8)
    cos = jnp.cos(angle)[:, None]                                       # [N,1,1]
    sin = jnp.sin(angle)[:, None]
    rx, ry, rz = rot_dir[:, 0:1], rot_dir[:, 1:2], rot_dir[:, 2:3]
    zeros = jnp.zeros_like(rx)
    K = jnp.concatenate(
        [zeros, -rz, ry, rz, zeros, -rx, -ry, rx, zeros], axis=1
    ).reshape(-1, 3, 3)
    ident = jnp.eye(3, dtype=rotvec.dtype)[None]
    return ident + sin * K + (1.0 - cos) * jnp.matmul(K, K)


def _round_up(x, m):
    return ((x + m - 1) // m) * m


def rotvector_mano_forward(params, global_rvc, finger_rvc, shape, trans=None,
                           *, batch_tile=64):
    """Pallas-backed RotVectorManolayer.forward (apply_global_last=True).

    batch_tile default (64) keeps the fused kernel's VMEM footprint (~11 MB)
    under v5e's 16 MiB default scoped VMEM; re-derive before raising it on v7x
    (64 MiB physical / 32 MiB scoped default).
    """
    f32 = jnp.float32
    B = shape.shape[0]
    global_rvc = global_rvc.astype(f32)
    finger_rvc = finger_rvc.astype(f32)
    shape = shape.astype(f32)

    g_rmt = _rotvec_to_rotmat(global_rvc.reshape(-1, 3)).reshape(B, 3, 3)
    f_rmt = _rotvec_to_rotmat(finger_rvc.reshape(-1, 3)).reshape(B, 15, 3, 3)
    I3 = jnp.eye(3, dtype=f32)
    pose_feature = (f_rmt - I3[None, None]).reshape(B, NPOSE)

    # ---- jit-time constant weight layouts (params are closed over -> folded) ----
    pad_v = NVP - NV
    tmpl_row = jnp.pad(params['verts_template'].T,
                       ((0, 0), (0, pad_v))).reshape(1, VFLATP)          # [1, 2688]
    sdirs_pl = jnp.pad(jnp.transpose(params['shapedirs'], (2, 1, 0)),
                       ((0, 0), (0, 0), (0, pad_v))).reshape(NSHAPE, VFLATP)
    pdirs_pl = jnp.pad(
        jnp.transpose(params['posedirs'].reshape(NPOSE, NV, 3), (0, 2, 1)),
        ((0, 0), (0, 0), (0, pad_v))).reshape(NPOSE, VFLATP)
    blend_w = jnp.concatenate([sdirs_pl, pdirs_pl], axis=0)              # [145, 2688]
    w_extT = jnp.concatenate(
        [params['lbs_weights'], jnp.ones((NV, 1), f32)], axis=1).T       # [17, 778]
    w_extT = jnp.pad(w_extT, ((0, 0), (0, pad_v)))                       # [17, 896]
    # J_regressor folded through the shape blend (exact, K=10): J = J_tmpl + shape@JS
    JS = jnp.einsum('jv,vkl->jkl', params['J_regressor'], params['shapedirs'])
    J_tmpl = params['J_regressor'] @ params['verts_template']            # [16, 3]

    # ---- joints of the shaped template (tiny, plain JAX, exact in f32) ----------
    J = J_tmpl[None] + jnp.einsum('bl,jkl->bjk', shape, JS)              # [B,16,3]

    # ---- rigid kinematic chain (tiny O(B*16) 4x4 algebra, plain JAX) ------------
    # TODO(synk): 16 sequential 4x4 composes per batch stay in plain JAX; too tiny
    # / chain-dependent to be a useful Pallas hot path.
    parents = params['kintree_table'][1:]
    J_rel = J.at[:, 1:].set(J[:, 1:] - J[:, parents])
    transform_rmt = jnp.concatenate(
        [jnp.broadcast_to(I3[None, None], (B, 1, 3, 3)), f_rmt], axis=1)
    R = transform_rmt.reshape(-1, 3, 3)
    T = J_rel.reshape(-1, 3, 1)
    Rp = jnp.concatenate([R, jnp.zeros((R.shape[0], 1, 3), f32)], axis=1)
    Tp = jnp.concatenate([T, jnp.ones((T.shape[0], 1, 1), f32)], axis=1)
    M = jnp.concatenate([Rp, Tp], axis=2).reshape(B, NJ, 4, 4)
    root_M = M[:, :1]
    finger_M = M[:, 1:].reshape(B, 5, 3, 4, 4)
    f0 = jnp.matmul(jnp.broadcast_to(root_M, (B, 5, 4, 4)), finger_M[:, :, 0])
    f1 = jnp.matmul(f0, finger_M[:, :, 1])
    f2 = jnp.matmul(f1, finger_M[:, :, 2])
    fM = jnp.stack([f0, f1, f2], axis=2).reshape(B, 15, 4, 4)
    M = jnp.concatenate([root_M, fM], axis=1)
    J_transformed = M[:, :, :3, 3]
    t_new = J_transformed - jnp.matmul(M[:, :, :3, :3], J[..., None])[..., 0]
    M_top = jnp.concatenate([M[:, :, :3, :3], t_new[..., None]], axis=-1)  # [B,16,3,4]

    trans_arr = jnp.zeros((1, 3), f32) if trans is None else trans.astype(f32)
    trans_b = jnp.broadcast_to(trans_arr.reshape(-1, 3), (B, 3))

    # Fold the global rotation G into every joint transform (exact: blending is
    # linear), drop the unused [0,0,0,1] bottom row (only 12 coefficients are read)
    # and carry the translation t via an extra "joint" row with weight 1.
    M_top_g = jnp.einsum('bpq,bjqc->bjpc', g_rmt, M_top)                   # [B,16,3,4]
    A = M_top_g.reshape(B, NJ, NCOEF)                                      # c = 4*i + k
    t_row = jnp.zeros((B, NCOEF), f32).at[:, jnp.array([3, 7, 11])].set(trans_b)
    A = jnp.concatenate([A, t_row[:, None, :]], axis=1)                    # [B, 17, 12]

    # ---- batch tiling: >=2 "parallel" grid steps when possible (v7x megacore),
    #      tiles are multiples of 8 and pad the batch so every block is full -------
    bt = min(batch_tile, max(8, _round_up((B + 1) // 2, 8)))
    b_pad = _round_up(B, bt)
    n_tiles = b_pad // bt

    sp = jnp.concatenate([shape, pose_feature], axis=1)                    # [B, 145]
    sp = jnp.pad(sp, ((0, b_pad - B), (0, 0)))
    A = jnp.pad(A, ((0, b_pad - B), (0, 0), (0, 0)))
    # rows ordered (tile, coefficient, batch-in-tile) so the kernel's per-coefficient
    # slices are contiguous sublane blocks (no strided extracts in the kernel)
    m_tiles = (jnp.transpose(A, (2, 0, 1))                                 # [12, b_pad, 17]
               .reshape(NCOEF, n_tiles, bt, NJ + 1)
               .transpose(1, 0, 2, 3)
               .reshape(n_tiles * NCOEF * bt, NJ + 1))

    # ---- fused blend + skin Pallas kernel ---------------------------------------
    verts_T = _mano_fused_pallas(sp, m_tiles, tmpl_row, blend_w, w_extT, bt, b_pad)
    verts = jnp.transpose(verts_T[:, :B, :NV], (1, 2, 0))                  # [B,778,3]

    joints16 = jnp.matmul(J_transformed, jnp.swapaxes(g_rmt, -1, -2)) \
        + trans_arr.reshape(-1, 1, 3)
    joints = jnp.concatenate(
        [joints16, verts[:, params['extra_tips_idxs'], :]], axis=1)
    joints = joints[:, JOINT_REORDER, :]
    return verts, joints


# ----------------------------------------------------------------------------
# Pure-JAX reference (direct transcription of the torch module) for validation
# ----------------------------------------------------------------------------
def ref_forward(params, global_rvc, finger_rvc, shape, trans):
    B = shape.shape[0]
    f32 = jnp.float32
    g_rmt = _rotvec_to_rotmat(global_rvc.reshape(-1, 3)).reshape(B, 1, 3, 3)
    f_rmt = _rotvec_to_rotmat(finger_rvc.reshape(-1, 3)).reshape(B, 15, 3, 3)
    pose = jnp.concatenate([g_rmt, f_rmt], axis=1)

    I = jnp.eye(3, dtype=f32)[None, None]
    V = params['verts_template'][None] + jnp.einsum(
        'bl,vkl->bvk', shape, params['shapedirs'])
    J = jnp.einsum('bvk,jv->bjk', V, params['J_regressor'])
    global_rmt = pose[:, 0]
    finger_rmt = pose[:, 1:]
    pose_feature = (finger_rmt - I).reshape(B, -1)
    V = V + (pose_feature @ params['posedirs']).reshape(B, -1, 3)
    transform_rmt = jnp.concatenate(
        [jnp.broadcast_to(I, (B, 1, 3, 3)), finger_rmt], axis=1)
    parents = params['kintree_table'][1:]
    J_rel = J.at[:, 1:].set(J[:, 1:] - J[:, parents])
    R = transform_rmt.reshape(-1, 3, 3)
    T = J_rel.reshape(-1, 3, 1)
    Rp = jnp.concatenate([R, jnp.zeros((R.shape[0], 1, 3), f32)], axis=1)
    Tp = jnp.concatenate([T, jnp.ones((T.shape[0], 1, 1), f32)], axis=1)
    M = jnp.concatenate([Rp, Tp], axis=2).reshape(B, NJ, 4, 4)
    root_M = M[:, :1]
    finger_M = M[:, 1:].reshape(B, 5, 3, 4, 4)
    f0 = jnp.matmul(jnp.broadcast_to(root_M, (B, 5, 4, 4)), finger_M[:, :, 0])
    f1 = jnp.matmul(f0, finger_M[:, :, 1])
    f2 = jnp.matmul(f1, finger_M[:, :, 2])
    fM = jnp.stack([f0, f1, f2], axis=2).reshape(B, 15, 4, 4)
    M = jnp.concatenate([root_M, fM], axis=1)
    J_transformed = M[:, :, :3, 3]
    t_new = J_transformed - jnp.matmul(M[:, :, :3, :3], J[..., None])[..., 0]
    M_top = jnp.concatenate([M[:, :, :3, :3], t_new[..., None]], axis=-1)
    M = jnp.concatenate([M_top, M[:, :, 3:4, :]], axis=-2)
    W = jnp.broadcast_to(params['lbs_weights'][None], (B, NV, NJ))
    Mv = jnp.matmul(W, M.reshape(B, NJ, 16)).reshape(B, NV, 4, 4)
    V_t = (jnp.matmul(Mv[..., :3, :3], V[..., None]) + Mv[..., :3, 3:])[..., 0]
    J_transformed = jnp.matmul(J_transformed, jnp.swapaxes(global_rmt, -1, -2))
    V_t = jnp.matmul(V_t, jnp.swapaxes(global_rmt, -1, -2))

    V_t = V_t + trans.reshape(-1, 1, 3)
    J_out = J_transformed + trans.reshape(-1, 1, 3)
    J_out = jnp.concatenate(
        [J_out, V_t[:, params['extra_tips_idxs'], :]], axis=1)
    J_out = J_out[:, JOINT_REORDER, :]
    return V_t, J_out


# ----------------------------------------------------------------------------
if __name__ == "__main__":
    B = 2
    params = make_mano_params(jax.random.PRNGKey(1))

    key = jax.random.PRNGKey(0)
    k1, k2, k3, k4 = jax.random.split(key, 4)
    global_rvc = 0.5 * jax.random.normal(k1, (B, 1, 3), jnp.float32)
    finger_rvc = 0.3 * jax.random.normal(k2, (B, 15, 3), jnp.float32)
    shape = jax.random.normal(k3, (B, 10), jnp.float32)
    trans = 0.1 * jax.random.normal(k4, (B, 3), jnp.float32)

    fwd = jax.jit(functools.partial(rotvector_mano_forward, params))
    verts, joints = fwd(global_rvc, finger_rvc, shape, trans)
    jax.block_until_ready((verts, joints))

    assert verts.shape == (B, NV, 3), verts.shape
    assert joints.shape == (B, 21, 3), joints.shape

    # Tolerance accounts for default (single-pass bf16) MXU matmul precision on both
    # the Pallas path and the pure-JAX TPU reference; the J-regressor fold removed
    # the worst (K=2334) contraction so the actual error is well below this bound.
    v_ref, j_ref = ref_forward(params, global_rvc, finger_rvc, shape, trans)
    np.testing.assert_allclose(np.asarray(verts), np.asarray(v_ref),
                               atol=1e-2, rtol=1e-2)
    np.testing.assert_allclose(np.asarray(joints), np.asarray(j_ref),
                               atol=1e-2, rtol=1e-2)

    print("KERNEL_OK")
</pallas_src>

<mosaic_0001>
module attributes {stable_mosaic.version = 11 : i64} {
  func.func @_mano_fused_kernel(%arg0: i32, %arg1: memref<8x145xf32, #tpu.memory_space<vmem>>, %arg2: memref<96x17xf32, #tpu.memory_space<vmem>>, %arg3: memref<1x2688xf32, #tpu.memory_space<vmem>>, %arg4: memref<145x2688xf32, #tpu.memory_space<vmem>>, %arg5: memref<17x896xf32, #tpu.memory_space<vmem>>, %arg6: memref<3x8x896xf32, #tpu.memory_space<vmem>>) attributes {dimension_semantics = [#tpu.dimension_semantics<parallel>], iteration_bounds = array<i64: 1>, scalar_prefetch = 0 : i64, scratch_operands = 0 : i64, tpu.core_type = #tpu.core_type<tc>, window_params = [{transform_indices = @transform_0, window_bounds = array<i64: 8, 145>}, {transform_indices = @transform_1, window_bounds = array<i64: 96, 17>}, {pipeline_mode = #tpu.pipeline_mode<synchronous>, transform_indices = @transform_2, window_bounds = array<i64: 1, 2688>}, {pipeline_mode = #tpu.pipeline_mode<synchronous>, transform_indices = @transform_3, window_bounds = array<i64: 145, 2688>}, {pipeline_mode = #tpu.pipeline_mode<synchronous>, transform_indices = @transform_4, window_bounds = array<i64: 17, 896>}, {transform_indices = @transform_5, window_bounds = array<i64: 3, 8, 896>}]} {
    %c0 = arith.constant 0 : index
    %c0_0 = arith.constant 0 : index
    %0 = vector.load %arg3[%c0, %c0_0] : memref<1x2688xf32, #tpu.memory_space<vmem>>, vector<1x2688xf32>
    %c0_1 = arith.constant 0 : index
    %c0_2 = arith.constant 0 : index
    %1 = vector.load %arg1[%c0_1, %c0_2] : memref<8x145xf32, #tpu.memory_space<vmem>>, vector<8x145xf32>
    %c0_3 = arith.constant 0 : index
    %c0_4 = arith.constant 0 : index
    %2 = vector.load %arg4[%c0_3, %c0_4] : memref<145x2688xf32, #tpu.memory_space<vmem>>, vector<145x2688xf32>
    %cst = arith.constant dense<0.000000e+00> : vector<8x2688xf32>
    %3 = tpu.matmul %1, %2, %cst {dimension_numbers = #tpu.dot_dimension_numbers<[1], [0], [0], [1], [0, 0, 1, 1], [], []>} : vector<8x145xf32>, vector<145x2688xf32>, vector<8x2688xf32> -> vector<8x2688xf32>
    %4 = vector.broadcast %0 : vector<1x2688xf32> to vector<8x2688xf32>
    %5 = arith.addf %4, %3 : vector<8x2688xf32>
    %6 = vector.extract_strided_slice %5 {offsets = [0, 0], sizes = [8, 896], strides = [1, 1]} : vector<8x2688xf32> to vector<8x896xf32>
    %7 = vector.extract_strided_slice %5 {offsets = [0, 896], sizes = [8, 896], strides = [1, 1]} : vector<8x2688xf32> to vector<8x896xf32>
    %8 = vector.extract_strided_slice %5 {offsets = [0, 1792], sizes = [8, 896], strides = [1, 1]} : vector<8x2688xf32> to vector<8x896xf32>
    %c0_5 = arith.constant 0 : index
    %c0_6 = arith.constant 0 : index
    %9 = vector.load %arg2[%c0_5, %c0_6] : memref<96x17xf32, #tpu.memory_space<vmem>>, vector<96x17xf32>
    %c0_7 = arith.constant 0 : index
    %c0_8 = arith.constant 0 : index
    %10 = vector.load %arg5[%c0_7, %c0_8] : memref<17x896xf32, #tpu.memory_space<vmem>>, vector<17x896xf32>
    %cst_9 = arith.constant dense<0.000000e+00> : vector<96x896xf32>
    %11 = tpu.matmul %9, %10, %cst_9 {dimension_numbers = #tpu.dot_dimension_numbers<[1], [0], [0], [1], [0, 0, 1, 1], [], []>} : vector<96x17xf32>, vector<17x896xf32>, vector<96x896xf32> -> vector<96x896xf32>
    %12 = vector.extract_strided_slice %11 {offsets = [0, 0], sizes = [8, 896], strides = [1, 1]} : vector<96x896xf32> to vector<8x896xf32>
    %13 = arith.mulf %12, %6 : vector<8x896xf32>
    %14 = vector.extract_strided_slice %11 {offsets = [8, 0], sizes = [8, 896], strides = [1, 1]} : vector<96x896xf32> to vector<8x896xf32>
    %15 = arith.mulf %14, %7 : vector<8x896xf32>
    %16 = arith.addf %13, %15 : vector<8x896xf32>
    %17 = vector.extract_strided_slice %11 {offsets = [16, 0], sizes = [8, 896], strides = [1, 1]} : vector<96x896xf32> to vector<8x896xf32>
    %18 = arith.mulf %17, %8 : vector<8x896xf32>
    %19 = arith.addf %16, %18 : vector<8x896xf32>
    %20 = vector.extract_strided_slice %11 {offsets = [24, 0], sizes = [8, 896], strides = [1, 1]} : vector<96x896xf32> to vector<8x896xf32>
    %21 = arith.addf %19, %20 : vector<8x896xf32>
    %c0_10 = arith.constant 0 : index
    %c0_11 = arith.constant 0 : index
    %c0_12 = arith.constant 0 : index
    %22 = vector.load %arg6[%c0_10, %c0_11, %c0_12] : memref<3x8x896xf32, #tpu.memory_space<vmem>>, vector<1x8x896xf32>
    %23 = vector.shape_cast %22 : vector<1x8x896xf32> to vector<8x896xf32>
    %24 = vector.shape_cast %21 : vector<8x896xf32> to vector<1x8x896xf32>
    tpu.vector_store %arg6[%c0_10, %c0_11, %c0_12], %24 {strides = array<i32>} : memref<3x8x896xf32, #tpu.memory_space<vmem>>, vector<1x8x896xf32>,
    %25 = vector.extract_strided_slice %11 {offsets = [32, 0], sizes = [8, 896], strides = [1, 1]} : vector<96x896xf32> to vector<8x896xf32>
    %26 = arith.mulf %25, %6 : vector<8x896xf32>
    %27 = vector.extract_strided_slice %11 {offsets = [40, 0], sizes = [8, 896], strides = [1, 1]} : vector<96x896xf32> to vector<8x896xf32>
    %28 = arith.mulf %27, %7 : vector<8x896xf32>
    %29 = arith.addf %26, %28 : vector<8x896xf32>
    %30 = vector.extract_strided_slice %11 {offsets = [48, 0], sizes = [8, 896], strides = [1, 1]} : vector<96x896xf32> to vector<8x896xf32>
    %31 = arith.mulf %30, %8 : vector<8x896xf32>
    %32 = arith.addf %29, %31 : vector<8x896xf32>
    %33 = vector.extract_strided_slice %11 {offsets = [56, 0], sizes = [8, 896], strides = [1, 1]} : vector<96x896xf32> to vector<8x896xf32>
    %34 = arith.addf %32, %33 : vector<8x896xf32>
    %c1 = arith.constant 1 : index
    %c0_13 = arith.constant 0 : index
    %c0_14 = arith.constant 0 : index
    %35 = vector.load %arg6[%c1, %c0_13, %c0_14] : memref<3x8x896xf32, #tpu.memory_space<vmem>>, vector<1x8x896xf32>
    %36 = vector.shape_cast %35 : vector<1x8x896xf32> to vector<8x896xf32>
    %37 = vector.shape_cast %34 : vector<8x896xf32> to vector<1x8x896xf32>
    tpu.vector_store %arg6[%c1, %c0_13, %c0_14], %37 {strides = array<i32>} : memref<3x8x896xf32, #tpu.memory_space<vmem>>, vector<1x8x896xf32>,
    %38 = vector.extract_strided_slice %11 {offsets = [64, 0], sizes = [8, 896], strides = [1, 1]} : vector<96x896xf32> to vector<8x896xf32>
    %39 = arith.mulf %38, %6 : vector<8x896xf32>
    %40 = vector.extract_strided_slice %11 {offsets = [72, 0], sizes = [8, 896], strides = [1, 1]} : vector<96x896xf32> to vector<8x896xf32>
    %41 = arith.mulf %40, %7 : vector<8x896xf32>
    %42 = arith.addf %39, %41 : vector<8x896xf32>
    %43 = vector.extract_strided_slice %11 {offsets = [80, 0], sizes = [8, 896], strides = [1, 1]} : vector<96x896xf32> to vector<8x896xf32>
    %44 = arith.mulf %43, %8 : vector<8x896xf32>
    %45 = arith.addf %42, %44 : vector<8x896xf32>
    %46 = vector.extract_strided_slice %11 {offsets = [88, 0], sizes = [8, 896], strides = [1, 1]} : vector<96x896xf32> to vector<8x896xf32>
    %47 = arith.addf %45, %46 : vector<8x896xf32>
    %c2 = arith.constant 2 : index
    %c0_15 = arith.constant 0 : index
    %c0_16 = arith.constant 0 : index
    %48 = vector.load %arg6[%c2, %c0_15, %c0_16] : memref<3x8x896xf32, #tpu.memory_space<vmem>>, vector<1x8x896xf32>
    %49 = vector.shape_cast %48 : vector<1x8x896xf32> to vector<8x896xf32>
    %50 = vector.shape_cast %47 : vector<8x896xf32> to vector<1x8x896xf32>
    tpu.vector_store %arg6[%c2, %c0_15, %c0_16], %50 {strides = array<i32>} : memref<3x8x896xf32, #tpu.memory_space<vmem>>, vector<1x8x896xf32>,
    return
  }
  func.func @transform_0(%arg0: i32) -> (i32, i32) {
    %c0_i32 = arith.constant 0 : i32
    %c0_i32_0 = arith.constant 0 : i32
    return %arg0, %c0_i32 : i32, i32
  }
  func.func @transform_1(%arg0: i32) -> (i32, i32) {
    %c0_i32 = arith.constant 0 : i32
    %c0_i32_0 = arith.constant 0 : i32
    return %arg0, %c0_i32 : i32, i32
  }
  func.func @transform_2(%arg0: i32) -> (i32, i32) {
    %c0_i32 = arith.constant 0 : i32
    %c0_i32_0 = arith.constant 0 : i32
    %c0_i32_1 = arith.constant 0 : i32
    return %c0_i32, %c0_i32_0 : i32, i32
  }
  func.func @transform_3(%arg0: i32) -> (i32, i32) {
    %c0_i32 = arith.constant 0 : i32
    %c0_i32_0 = arith.constant 0 : i32
    %c0_i32_1 = arith.constant 0 : i32
    return %c0_i32, %c0_i32_0 : i32, i32
  }
  func.func @transform_4(%arg0: i32) -> (i32, i32) {
    %c0_i32 = arith.constant 0 : i32
    %c0_i32_0 = arith.constant 0 : i32
    %c0_i32_1 = arith.constant 0 : i32
    return %c0_i32, %c0_i32_0 : i32, i32
  }
  func.func @transform_5(%arg0: i32) -> (i32, i32, i32) {
    %c0_i32 = arith.constant 0 : i32
    %c0_i32_0 = arith.constant 0 : i32
    %c0_i32_1 = arith.constant 0 : i32
    return %c0_i32, %arg0, %c0_i32_0 : i32, i32, i32
  }
}

</mosaic_0001>

<bundles_post_ra>
// kernel: rotvector_mano_forward.1
= control target key start
LH: loop header
LB: loop body
LE: loop exit
PB: predicated region body
PF: predicated region fallthrough
CT: control target
= control target key end

     0   :  { %10 = vsyncpa [#allocation3], 0  ;;  %s2207_s21 = smov [#allocation2]   ;;  %s2208_s23 = smov 896   ;;  %s4089_s0 = inlined_call_operand.vmem [shape: f32[8,145], index: 0, kind: input, shape index: {}]   ;;  %s4090_s1 = inlined_call_operand.vmem [shape: f32[96,17], index: 1, kind: input, shape index: {}]   ;;  %s4091_s2 = inlined_call_operand.vmem [shape: f32[1,2688], index: 2, kind: input, shape index: {}]   ;;  %s4092_s3 = inlined_call_operand.vmem [shape: f32[145,2688], index: 3, kind: input, shape index: {}]   ;;  %s4093_s4 = inlined_call_operand.hbm [shape: f32[17,896], index: 4, kind: input, shape index: {}]   ;;  %s4094_s5 = inlined_call_operand.vmem [shape: f32[3,8,896], index: 5, kind: output, shape index: {}]  }
   0x1   :  { %s23_s20 = sshll.u32 %s4093_s4, 4  ;;  %s25_s22 = sshll.u32 %s2207_s21, 4  ;;  %s24_s20 = int_to_ptr.hbm [resolvable:$true] %s23_s20  ;;  %s26_s22 = int_to_ptr.vmem [resolvable:$true] %s25_s22 }
   0x2   :  { %s2209_s24 = smov 56  }
   0x3   :  { %31 = dma.hbm_to_vmem [thread:$0]  %s24_s20, 2688, %s26_s22, [#allocation3], %s2208_s23, %s2208_s23, %s2209_s24  }
   0x4   :  { %2205 = dma.done.wait [#allocation3], 2688  }
   0x5   :  { %2206 = vsyncadd [#allocation3], 4294964608  ;;  %vm444_vm0 = vcmask 1040384   ;;  %v356_v0 = vld [vmem:[%s4092_s3 + $0x9d8] sm:$0xff]  ;;  %v419_v1 = vld [vmem:[%s4092_s3 + $0xbd0] sm:$0x1] }
   0x6   :  { %v357_v2 = vld [vmem:[%s4092_s3 + $0x9e0] sm:$0xff]  ;;  %508 = vmatpush.msra.mxu0 %v356_v0  ;;  %2029 = vmatpush.msk.msra.mxu1 %vm444_vm0, %v419_v1  ;;  %v420_v3 = vld [vmem:[%s4092_s3 + $0xbd8] sm:$0x1]  ;;  %v335_v4 = vld [vmem:[%s4092_s3 + $0x930] sm:$0xff]  ;;  %vm440_vm1 = vcmask 138240  }
   0x7   :  { %v398_v5 = vld [vmem:[%s4092_s3 + $0xb28] sm:$0xff]  ;;  %548 = vmatpush.msra.mxu2 %v357_v2  ;;  %2031 = vmatpush.msk.msra.mxu3 %vm444_vm0, %v420_v3  ;;  %v336_v6 = vld [vmem:[%s4092_s3 + $0x938] sm:$0xff]  ;;  %v399_v7 = vld [vmem:[%s4092_s3 + $0xb30] sm:$0xff] }
   0x8   :  { %v314_v8 = vld [vmem:[%s4092_s3 + $0x888] sm:$0xff]  ;;  %509 = vmatpush.msra.mxu0 %v335_v4  ;;  %542 = vmatpush.msra.mxu1 %v398_v5  ;;  %v377_v9 = vld [vmem:[%s4092_s3 + $0xa80] sm:$0xff]  ;;  %v315_v10 = vld [vmem:[%s4092_s3 + $0x890] sm:$0xff] }
   0x9   :  { %v378_v11 = vld [vmem:[%s4092_s3 + $0xa88] sm:$0xff]  ;;  %549 = vmatpush.msra.mxu2 %v336_v6  ;;  %582 = vmatpush.msra.mxu3 %v399_v7  ;;  %v293_v14 = vld [vmem:[%s4092_s3 + $0x7e0] sm:$0xff]  ;;  %v423_v16 = vld [vmem:[%s4092_s3 + $0xbf0] sm:$0x1] }
   0xa   :  { %v2284_v12 = vld [vmem:[%s4089_s0 + $0x8] sm:$0xff]  ;;  %510 = vmatpush.msra.mxu0 %v314_v8  ;;  %543 = vmatpush.msra.mxu1 %v377_v9  ;;  %v337_v17 = vld [vmem:[%s4092_s3 + $0x940] sm:$0xff]  ;;  %v272_v18 = vld [vmem:[%s4092_s3 + $0x738] sm:$0xff] }
   0xb   :  { %v358_v13 = vld [vmem:[%s4092_s3 + $0x9e8] sm:$0xff]  ;;  %550 = vmatpush.msra.mxu2 %v315_v10  ;;  %583 = vmatpush.msra.mxu3 %v378_v11  ;;  %v273_v19 = vld [vmem:[%s4092_s3 + $0x740] sm:$0xff]  ;;  %v316_v21 = vld [vmem:[%s4092_s3 + $0x898] sm:$0xff] }
   0xc   :  { %v294_v15 = vld [vmem:[%s4092_s3 + $0x7e8] sm:$0xff]  ;;  %2030 = vmatmul.msk.f32.vlgmr.msra.gmra.mxu1 %vm440_vm1, %v2284_v12  ;;  %511 = vmatpush.msra.mxu0 %v293_v14  ;;  %v251_v22 = vld [vmem:[%s4092_s3 + $0x690] sm:$0xff]  ;;  %v252_v23 = vld [vmem:[%s4092_s3 + $0x698] sm:$0xff] }
   0xd   :  { %588 = vmatpush.msrb.mxu3 %v358_v13  ;;  %551 = vmatpush.msra.mxu2 %v294_v15  ;;  %v402_v20 = vld [vmem:[%s4092_s3 + $0xb48] sm:$0xff]  ;;  %v381_v24 = vld [vmem:[%s4092_s3 + $0xaa0] sm:$0xff]  ;;  %v295_v25 = vld [vmem:[%s4092_s3 + $0x7f0] sm:$0xff] }
   0xe   :  { %2037 = vmatpush.msk.msrb.mxu1 %vm444_vm0, %v423_v16  ;;  %512 = vmatpush.msra.mxu0 %v272_v18  ;;  %v424_v26 = vld [vmem:[%s4092_s3 + $0xbf8] sm:$0x1]  ;;  %v230_v27 = vld [vmem:[%s4092_s3 + $0x5e8] sm:$0xff]  ;;  %v231_v28 = vld [vmem:[%s4092_s3 + $0x5f0] sm:$0xff] }
   0xf   :  { %589 = vmatpush.msrb.mxu3 %v337_v17  ;;  %552 = vmatpush.msra.mxu2 %v273_v19  ;;  %v274_v29 = vld [vmem:[%s4092_s3 + $0x748] sm:$0xff]  ;;  %v209_v30 = vld [vmem:[%s4092_s3 + $0x540] sm:$0xff]  ;;  %v403_v31 = vld [vmem:[%s4092_s3 + $0xb50] sm:$0xff] }
  0x10   :  { %702 = vmatpush.msrb.mxu1 %v402_v20  ;;  %513 = vmatpush.msra.mxu0 %v251_v22  ;;  %v210_v32 = vld [vmem:[%s4092_s3 + $0x548] sm:$0xff]  ;;  %v253_v33 = vld [vmem:[%s4092_s3 + $0x6a0] sm:$0xff]  ;;  %v188_v34 = vld [vmem:[%s4092_s3 + $0x498] sm:$0xff] }
  0x11   :  { %590 = vmatpush.msrb.mxu3 %v316_v21  ;;  %553 = vmatpush.msra.mxu2 %v252_v23  ;;  %v382_v35 = vld [vmem:[%s4092_s3 + $0xaa8] sm:$0xff]  ;;  %v189_v36 = vld [vmem:[%s4092_s3 + $0x4a0] sm:$0xff]  ;;  %v232_v38 = vld [vmem:[%s4092_s3 + $0x5f8] sm:$0xff] }
  0x12   :  { %703 = vmatpush.msrb.mxu1 %v381_v24  ;;  %514 = vmatpush.msra.mxu0 %v230_v27  ;;  %v425_v37 = vld [vmem:[%s4092_s3 + $0xc00] sm:$0x1]  ;;  %v167_v39 = vld [vmem:[%s4092_s3 + $0x3f0] sm:$0xff]  ;;  %v168_v40 = vld [vmem:[%s4092_s3 + $0x3f8] sm:$0xff] }
  0x13   :  { %591 = vmatpush.msrb.mxu3 %v295_v25  ;;  %554 = vmatpush.msra.mxu2 %v231_v28  ;;  %v404_v41 = vld [vmem:[%s4092_s3 + $0xb58] sm:$0xff]  ;;  %v211_v42 = vld [vmem:[%s4092_s3 + $0x550] sm:$0xff]  ;;  %v146_v43 = vld [vmem:[%s4092_s3 + $0x348] sm:$0xff] }
  0x14   :  { %2039 = vmatpush.msk.msra.mxu1 %vm444_vm0, %v424_v26  ;;  %515 = vmatpush.msra.mxu0 %v209_v30  ;;  %v147_v44 = vld [vmem:[%s4092_s3 + $0x350] sm:$0xff]  ;;  %v190_v46 = vld [vmem:[%s4092_s3 + $0x4a8] sm:$0xff]  ;;  %v125_v47 = vld [vmem:[%s4092_s3 + $0x2a0] sm:$0xff] }
  0x15   :  { %592 = vmatpush.msrb.mxu3 %v274_v29  ;;  %2038 = vmatmul.msk.f32.vlgmr.msrb.gmra.mxu1 %vm440_vm1, %v2284_v12  ;;  %v383_v45 = vld [vmem:[%s4092_s3 + $0xab0] sm:$0xff]  ;;  %v126_v49 = vld [vmem:[%s4092_s3 + $0x2a8] sm:$0xff]  ;;  %v169_v50 = vld [vmem:[%s4092_s3 + $0x400] sm:$0xff] }
  0x16   :  { %742 = vmatpush.msra.mxu1 %v403_v31  ;;  %555 = vmatpush.msra.mxu2 %v210_v32  ;;  %v363_v48 = vld [vmem:[%s4092_s3 + $0xa10] sm:$0xff]  ;;  %v104_v51 = vld [vmem:[%s4092_s3 + $0x1f8] sm:$0xff]  ;;  %v342_v52 = vld [vmem:[%s4092_s3 + $0x968] sm:$0xff] }
  0x17   :  { %593 = vmatpush.msrb.mxu3 %v253_v33  ;;  %516 = vmatpush.msra.mxu0 %v188_v34  ;;  %v105_v53 = vld [vmem:[%s4092_s3 + $0x200] sm:$0xff]  ;;  %v148_v54 = vld [vmem:[%s4092_s3 + $0x358] sm:$0xff]  ;;  %v83_v55 = vld [vmem:[%s4092_s3 + $0x150] sm:$0xff] }
  0x18   :  { %743 = vmatpush.msra.mxu1 %v382_v35  ;;  %556 = vmatpush.msra.mxu2 %v189_v36  ;;  %v321_v56 = vld [vmem:[%s4092_s3 + $0x8c0] sm:$0xff]  ;;  %v84_v57 = vld [vmem:[%s4092_s3 + $0x158] sm:$0xff]  ;;  %v127_v58 = vld [vmem:[%s4092_s3 + $0x2b0] sm:$0xff] }
  0x19   :  { %594 = vmatpush.msrb.mxu3 %v232_v38  ;;  %517 = vmatpush.msra.mxu0 %v167_v39  ;;  %v62_v59 = vld [vmem:[%s4092_s3 + $0xa8] sm:$0xff]  ;;  %v300_v60 = vld [vmem:[%s4092_s3 + $0x818] sm:$0xff]  ;;  %v63_v61 = vld [vmem:[%s4092_s3 + $0xb0] sm:$0xff] }
  0x1a   :  { %2041 = vmatpush.msk.msrb.mxu1 %vm444_vm0, %v425_v37  ;;  %557 = vmatpush.msra.mxu2 %v168_v40  ;;  %v41_v62 = vld [vmem:[%s4092_s3] sm:$0xff]  ;;  %v106_v63 = vld [vmem:[%s4092_s3 + $0x208] sm:$0xff]  ;;  %v279_v0 = vld [vmem:[%s4092_s3 + $0x770] sm:$0xff] }
  0x1b   :  { %595 = vmatpush.msrb.mxu3 %v211_v42  ;;  %518 = vmatpush.msra.mxu0 %v146_v43  ;;  %v42_v1 = vld [vmem:[%s4092_s3 + $0x8] sm:$0xff]  ;;  %v2457_v2 = vld [vmem:[%s4089_s0] sm:$0xff]  ;;  %v360_v5 = vld [vmem:[%s4092_s3 + $0x9f8] sm:$0xff] }
  0x1c   :  { %782 = vmatpush.msrb.mxu1 %v404_v41  ;;  %558 = vmatpush.msra.mxu2 %v147_v44  ;;  %v85_v3 = vld [vmem:[%s4092_s3 + $0x160] sm:$0xff]  ;;  %v422_v4 = vld [vmem:[%s4092_s3 + $0xbe8] sm:$0x1]  ;;  %v64_v7 = vld [vmem:[%s4092_s3 + $0xb8] sm:$0xff] }
  0x1d   :  { %596 = vmatpush.msrb.mxu3 %v190_v46  ;;  %2040 = vmatmul.msk.f32.vlgmr.msra.gmra.mxu1 %vm440_vm1, %v2284_v12  ;;  %v258_v6 = vld [vmem:[%s4092_s3 + $0x6c8] sm:$0xff]  ;;  %v401_v8 = vld [vmem:[%s4092_s3 + $0xb40] sm:$0xff]  ;;  %v339_v9 = vld [vmem:[%s4092_s3 + $0x950] sm:$0xff] }
  0x1e   :  { %783 = vmatpush.msrb.mxu1 %v383_v45  ;;  %519 = vmatpush.msra.mxu0 %v125_v47  ;;  %v237_v10 = vld [vmem:[%s4092_s3 + $0x620] sm:$0xff]  ;;  %v43_v11 = vld [vmem:[%s4092_s3 + $0x10] sm:$0xff]  ;;  %v380_v13 = vld [vmem:[%s4092_s3 + $0xa98] sm:$0xff] }
  0x1f   :  { %559 = vmatpush.msra.mxu2 %v126_v49  ;;  %597 = vmatpush.msrb.mxu3 %v169_v50  ;;  %v318_v14 = vld [vmem:[%s4092_s3 + $0x8a8] sm:$0xff]  ;;  %v216_v15 = vld [vmem:[%s4092_s3 + $0x578] sm:$0xff]  ;;  %v421_v16 = vld [vmem:[%s4092_s3 + $0xbe0] sm:$0x1] }
  0x20   :  { %788 = vmatpush.msra.mxu1 %v363_v48  ;;  %520 = vmatpush.msra.mxu0 %v104_v51  ;;  %v426_v17 = vld [vmem:[%s4092_s3 + $0xc08] sm:$0x1]  ;;  %v297_v18 = vld [vmem:[%s4092_s3 + $0x800] sm:$0xff]  ;;  %v195_v19 = vld [vmem:[%s4092_s3 + $0x4d0] sm:$0xff] }
  0x21   :  { %560 = vmatpush.msra.mxu2 %v105_v53  ;;  %598 = vmatpush.msrb.mxu3 %v148_v54  ;;  %v400_v20 = vld [vmem:[%s4092_s3 + $0xb38] sm:$0xff]  ;;  %v405_v21 = vld [vmem:[%s4092_s3 + $0xb60] sm:$0xff]  ;;  %v174_v23 = vld [vmem:[%s4092_s3 + $0x428] sm:$0xff] }
  0x22   :  { %789 = vmatpush.msra.mxu1 %v342_v52  ;;  %521 = vmatpush.msra.mxu0 %v83_v55  ;;  %v276_v22 = vld [vmem:[%s4092_s3 + $0x758] sm:$0xff]  ;;  %v379_v24 = vld [vmem:[%s4092_s3 + $0xa90] sm:$0xff]  ;;  %v153_v28 = vld [vmem:[%s4092_s3 + $0x380] sm:$0xff] }
  0x23   :  { %561 = vmatpush.msra.mxu2 %v84_v57  ;;  %599 = vmatpush.msrb.mxu3 %v127_v58  ;;  %v384_v25 = vld [vmem:[%s4092_s3 + $0xab8] sm:$0xff]  ;;  %v359_v26 = vld [vmem:[%s4092_s3 + $0x9f0] sm:$0xff]  ;;  %v338_v30 = vld [vmem:[%s4092_s3 + $0x948] sm:$0xff] }
  0x24   :  { %790 = vmatpush.msra.mxu1 %v321_v56  ;;  %522 = vmatpush.msra.mxu0 %v62_v59  ;;  %v255_v27 = vld [vmem:[%s4092_s3 + $0x6b0] sm:$0xff]  ;;  %v364_v29 = vld [vmem:[%s4092_s3 + $0xa18] sm:$0xff]  ;;  %v234_v31 = vld [vmem:[%s4092_s3 + $0x608] sm:$0xff] }
  0x25   :  { %562 = vmatpush.msra.mxu2 %v63_v61  ;;  %2032 = vmatmul.msk.f32.vlgmr.msra.gmra.mxu3 %vm440_vm1, %v2284_v12  ;;  %v132_v32 = vld [vmem:[%s4092_s3 + $0x2d8] sm:$0xff]  ;;  %v343_v33 = vld [vmem:[%s4092_s3 + $0x970] sm:$0xff]  ;;  %v317_v34 = vld [vmem:[%s4092_s3 + $0x8a0] sm:$0xff] }
  0x26   :  { %791 = vmatpush.msra.mxu1 %v300_v60  ;;  %523 = vmatpush.msra.mxu0 %v41_v62  ;;  %v213_v35 = vld [vmem:[%s4092_s3 + $0x560] sm:$0xff]  ;;  %v111_v36 = vld [vmem:[%s4092_s3 + $0x230] sm:$0xff]  ;;  %v322_v37 = vld [vmem:[%s4092_s3 + $0x8c8] sm:$0xff] }
  0x27   :  { %600 = vmatpush.msrb.mxu3 %v106_v63  ;;  %563 = vmatpush.msra.mxu2 %v42_v1  ;;  %v296_v38 = vld [vmem:[%s4092_s3 + $0x7f8] sm:$0xff]  ;;  %v90_v40 = vld [vmem:[%s4092_s3 + $0x188] sm:$0xff]  ;;  %v301_v41 = vld [vmem:[%s4092_s3 + $0x820] sm:$0xff] }
  0x28   :  { %792 = vmatpush.msra.mxu1 %v279_v0  ;;  %524 = vmatmul.f32.vlgmr.msra.gmra.mxu0 %v2457_v2  ;;  %v192_v39 = vld [vmem:[%s4092_s3 + $0x4b8] sm:$0xff]  ;;  %v275_v42 = vld [vmem:[%s4092_s3 + $0x750] sm:$0xff]  ;;  %v69_v45 = vld [vmem:[%s4092_s3 + $0xe0] sm:$0xff] }
  0x29   :  { %601 = vmatpush.msrb.mxu3 %v85_v3  ;;  %2035 = vmatpush.msk.msrb.mxu0 %vm444_vm0, %v422_v4  ;;  %v171_v43 = vld [vmem:[%s4092_s3 + $0x410] sm:$0xff]  ;;  %v280_v44 = vld [vmem:[%s4092_s3 + $0x778] sm:$0xff]  ;;  %v254_v46 = vld [vmem:[%s4092_s3 + $0x6a8] sm:$0xff] }
  0x2a   :  { %668 = vmatpush.msrb.mxu2 %v360_v5  ;;  %793 = vmatpush.msra.mxu1 %v258_v6  ;;  %v150_v47 = vld [vmem:[%s4092_s3 + $0x368] sm:$0xff]  ;;  %v259_v48 = vld [vmem:[%s4092_s3 + $0x6d0] sm:$0xff]  ;;  %v48_v49 = vld [vmem:[%s4092_s3 + $0x38] sm:$0xff] }
  0x2b   :  { %564 = vmatmul.f32.vlgmr.msra.gmra.mxu2 %v2457_v2  ;;  %602 = vmatpush.msrb.mxu3 %v64_v7  ;;  %v233_v50 = vld [vmem:[%s4092_s3 + $0x600] sm:$0xff]  ;;  %v238_v53 = vld [vmem:[%s4092_s3 + $0x628] sm:$0xff]  ;;  %v212_v54 = vld [vmem:[%s4092_s3 + $0x558] sm:$0xff] }
  0x2c   :  { %662 = vmatpush.msrb.mxu0 %v401_v8  ;;  %669 = vmatpush.msrb.mxu2 %v339_v9  ;;  %v429_v51 = vld [vmem:[%s4092_s3 + $0xc20] sm:$0x1]  ;;  %v408_v55 = vld [vmem:[%s4092_s3 + $0xb78] sm:$0xff]  ;;  %v191_v58 = vld [vmem:[%s4092_s3 + $0x4b0] sm:$0xff] }
  0x2d   :  { %794 = vmatpush.msra.mxu1 %v237_v10  ;;  %603 = vmatpush.msrb.mxu3 %v43_v11  ;;  %v129_v52 = vld [vmem:[%s4092_s3 + $0x2c0] sm:$0xff]  ;;  %v108_v56 = vld [vmem:[%s4092_s3 + $0x218] sm:$0xff]  ;;  %v387_v59 = vld [vmem:[%s4092_s3 + $0xad0] sm:$0xff] }
  0x2e   :  { %663 = vmatpush.msrb.mxu0 %v380_v13  ;;  %670 = vmatpush.msrb.mxu2 %v318_v14  ;;  %v217_v57 = vld [vmem:[%s4092_s3 + $0x580] sm:$0xff]  ;;  %v87_v60 = vld [vmem:[%s4092_s3 + $0x170] sm:$0xff]  ;;  %v196_v61 = vld [vmem:[%s4092_s3 + $0x4d8] sm:$0xff] }
  0x2f   :  { %795 = vmatpush.msra.mxu1 %v216_v15  ;;  %604 = vmatmul.f32.vlgmr.msrb.gmra.mxu3 %v2457_v2  ;;  %v367_v62 = vld [vmem:[%s4092_s3 + $0xa30] sm:$0xff]  ;;  %v170_v63 = vld [vmem:[%s4092_s3 + $0x408] sm:$0xff]  ;;  %v149_v4 = vld [vmem:[%s4092_s3 + $0x360] sm:$0xff] }
  0x30   :  { %2033 = vmatpush.msk.msra.mxu3 %vm444_vm0, %v421_v16  ;;  %2043 = vmatpush.msk.msra.mxu0 %vm444_vm0, %v426_v17  ;;  %v66_v0 = vld [vmem:[%s4092_s3 + $0xc8] sm:$0xff]  ;;  %v175_v1 = vld [vmem:[%s4092_s3 + $0x430] sm:$0xff]  ;;  %v45_v5 = vld [vmem:[%s4092_s3 + $0x20] sm:$0xff] }
  0x31   :  { %671 = vmatpush.msrb.mxu2 %v297_v18  ;;  %796 = vmatpush.msra.mxu1 %v195_v19  ;;  %v346_v3 = vld [vmem:[%s4092_s3 + $0x988] sm:$0xff]  ;;  %v325_v7 = vld [vmem:[%s4092_s3 + $0x8e0] sm:$0xff]  ;;  %v428_v8 = vld [vmem:[%s4092_s3 + $0xc18] sm:$0x1] }
  0x32   :  { %622 = vmatpush.msra.mxu3 %v400_v20  ;;  %822 = vmatpush.msra.mxu0 %v405_v21  ;;  %v154_v6 = vld [vmem:[%s4092_s3 + $0x388] sm:$0xff]  ;;  %v128_v9 = vld [vmem:[%s4092_s3 + $0x2b8] sm:$0xff]  ;;  %v133_v10 = vld [vmem:[%s4092_s3 + $0x2e0] sm:$0xff] }
  0x33   :  { %672 = vmatpush.msrb.mxu2 %v276_v22  ;;  %797 = vmatpush.msra.mxu1 %v174_v23  ;;  %v304_v11 = vld [vmem:[%s4092_s3 + $0x838] sm:$0xff]  ;;  %v407_v13 = vld [vmem:[%s4092_s3 + $0xb70] sm:$0xff]  ;;  %v386_v17 = vld [vmem:[%s4092_s3 + $0xac8] sm:$0xff] }
  0x34   :  { %623 = vmatpush.msra.mxu3 %v379_v24  ;;  %823 = vmatpush.msra.mxu0 %v384_v25  ;;  %v107_v14 = vld [vmem:[%s4092_s3 + $0x210] sm:$0xff]  ;;  %v112_v15 = vld [vmem:[%s4092_s3 + $0x238] sm:$0xff]  ;;  %v86_v18 = vld [vmem:[%s4092_s3 + $0x168] sm:$0xff] }
  0x35   :  { %2036 = vmatmul.msk.f32.vlgmr.msrb.gmra.mxu0 %vm440_vm1, %v2284_v12  ;;  %673 = vmatpush.msrb.mxu2 %v255_v27  ;;  %v283_v16 = vld [vmem:[%s4092_s3 + $0x790] sm:$0xff]  ;;  %v366_v20 = vld [vmem:[%s4092_s3 + $0xa28] sm:$0xff]  ;;  %v65_v22 = vld [vmem:[%s4092_s3 + $0xc0] sm:$0xff] }
  0x36   :  { %628 = vmatpush.msrb.mxu3 %v359_v26  ;;  %798 = vmatpush.msra.mxu1 %v153_v28  ;;  %v91_v19 = vld [vmem:[%s4092_s3 + $0x190] sm:$0xff]  ;;  %v262_v21 = vld [vmem:[%s4092_s3 + $0x6e8] sm:$0xff]  ;;  %v345_v24 = vld [vmem:[%s4092_s3 + $0x980] sm:$0xff] }
  0x37   :  { %828 = vmatpush.msrb.mxu0 %v364_v29  ;;  %674 = vmatpush.msrb.mxu2 %v234_v31  ;;  %v70_v23 = vld [vmem:[%s4092_s3 + $0xe8] sm:$0xff]  ;;  %v241_v25 = vld [vmem:[%s4092_s3 + $0x640] sm:$0xff]  ;;  %v44_v26 = vld [vmem:[%s4092_s3 + $0x18] sm:$0xff] }
  0x38   :  { %629 = vmatpush.msrb.mxu3 %v338_v30  ;;  %799 = vmatpush.msra.mxu1 %v132_v32  ;;  %v49_v27 = vld [vmem:[%s4092_s3 + $0x40] sm:$0xff]  ;;  %v324_v28 = vld [vmem:[%s4092_s3 + $0x8d8] sm:$0xff]  ;;  %v427_v31 = vld [vmem:[%s4092_s3 + $0xc10] sm:$0x1] }
  0x39   :  { %829 = vmatpush.msrb.mxu0 %v343_v33  ;;  %2034 = vmatmul.msk.f32.vlgmr.msra.gmra.mxu3 %vm440_vm1, %v2284_v12  ;;  %v220_v29 = vld [vmem:[%s4092_s3 + $0x598] sm:$0xff]  ;;  %v361_v30 = vld [vmem:[%s4092_s3 + $0xa00] sm:$0xff]  ;;  %v303_v32 = vld [vmem:[%s4092_s3 + $0x830] sm:$0xff] }
  0x3a   :  { %630 = vmatpush.msrb.mxu3 %v317_v34  ;;  %675 = vmatpush.msrb.mxu2 %v213_v35  ;;  %v199_v33 = vld [vmem:[%s4092_s3 + $0x4f0] sm:$0xff]  ;;  %v340_v34 = vld [vmem:[%s4092_s3 + $0x958] sm:$0xff]  ;;  %v406_v35 = vld [vmem:[%s4092_s3 + $0xb68] sm:$0xff] }
  0x3b   :  { %800 = vmatpush.msra.mxu1 %v111_v36  ;;  %830 = vmatpush.msrb.mxu0 %v322_v37  ;;  %v282_v36 = vld [vmem:[%s4092_s3 + $0x788] sm:$0xff] }
  0x3c   :  { %631 = vmatpush.msrb.mxu3 %v296_v38  ;;  %676 = vmatpush.msrb.mxu2 %v192_v39  ;;  %v178_v37 = vld [vmem:[%s4092_s3 + $0x448] sm:$0xff]  ;;  %v319_v38 = vld [vmem:[%s4092_s3 + $0x8b0] sm:$0xff]  ;;  %v385_v39 = vld [vmem:[%s4092_s3 + $0xac0] sm:$0xff] }
  0x3d   :  { %801 = vmatpush.msra.mxu1 %v90_v40  ;;  %831 = vmatpush.msrb.mxu0 %v301_v41  ;;  %v261_v40 = vld [vmem:[%s4092_s3 + $0x6e0] sm:$0xff] }
  0x3e   :  { %632 = vmatpush.msrb.mxu3 %v275_v42  ;;  %677 = vmatpush.msrb.mxu2 %v171_v43  ;;  %v157_v41 = vld [vmem:[%s4092_s3 + $0x3a0] sm:$0xff]  ;;  %v298_v42 = vld [vmem:[%s4092_s3 + $0x808] sm:$0xff] }
  0x3f   :  { %2042 = vmatmul.msk.f32.vlgmr.msrb.gmra.mxu1 %vm440_vm1, %v2284_v12  ;;  %832 = vmatpush.msrb.mxu0 %v280_v44  ;;  %v430_v43 = vld [vmem:[%s4092_s3 + $0xc28] sm:$0x1]  ;;  %v240_v44 = vld [vmem:[%s4092_s3 + $0x638] sm:$0xff] }
  0x40   :  { %802 = vmatpush.msra.mxu1 %v69_v45  ;;  %633 = vmatpush.msrb.mxu3 %v254_v46  ;;  %v136_v45 = vld [vmem:[%s4092_s3 + $0x2f8] sm:$0xff]  ;;  %v277_v46 = vld [vmem:[%s4092_s3 + $0x760] sm:$0xff] }
  0x41   :  { %678 = vmatpush.msrb.mxu2 %v150_v47  ;;  %833 = vmatpush.msrb.mxu0 %v259_v48  ;;  %v409_v47 = vld [vmem:[%s4092_s3 + $0xb80] sm:$0xff]  ;;  %v219_v48 = vld [vmem:[%s4092_s3 + $0x590] sm:$0xff] }
  0x42   :  { %803 = vmatpush.msra.mxu1 %v48_v49  ;;  %634 = vmatpush.msrb.mxu3 %v233_v50  ;;  %v115_v49 = vld [vmem:[%s4092_s3 + $0x250] sm:$0xff]  ;;  %v256_v50 = vld [vmem:[%s4092_s3 + $0x6b8] sm:$0xff] }
  0x43   :  { %679 = vmatpush.msrb.mxu2 %v129_v52  ;;  %834 = vmatpush.msrb.mxu0 %v238_v53  ;;  %v198_v52 = vld [vmem:[%s4092_s3 + $0x4e8] sm:$0xff] }
  0x44   :  { %2049 = vmatpush.msk.msrb.mxu1 %vm444_vm0, %v429_v51  ;;  %635 = vmatpush.msrb.mxu3 %v212_v54  ;;  %v388_v51 = vld [vmem:[%s4092_s3 + $0xad8] sm:$0xff]  ;;  %v94_v53 = vld [vmem:[%s4092_s3 + $0x1a8] sm:$0xff]  ;;  %v431_v54 = vld [vmem:[%s4092_s3 + $0xc30] sm:$0x1] }
  0x45   :  { %680 = vmatpush.msrb.mxu2 %v108_v56  ;;  %835 = vmatpush.msrb.mxu0 %v217_v57  ;;  %v177_v56 = vld [vmem:[%s4092_s3 + $0x440] sm:$0xff]  ;;  %v410_v57 = vld [vmem:[%s4092_s3 + $0xb88] sm:$0xff] }
  0x46   :  { %942 = vmatpush.msrb.mxu1 %v408_v55  ;;  %636 = vmatpush.msrb.mxu3 %v191_v58  ;;  %v235_v55 = vld [vmem:[%s4092_s3 + $0x610] sm:$0xff]  ;;  %v73_v58 = vld [vmem:[%s4092_s3 + $0x100] sm:$0xff] }
  0x47   :  { %681 = vmatpush.msrb.mxu2 %v87_v60  ;;  %804 = vmatmul.f32.vlgmr.msra.gmra.mxu1 %v2457_v2  ;;  %v156_v60 = vld [vmem:[%s4092_s3 + $0x398] sm:$0xff] }
  0x48   :  { %943 = vmatpush.msrb.mxu1 %v387_v59  ;;  %836 = vmatpush.msrb.mxu0 %v196_v61  ;;  %v214_v59 = vld [vmem:[%s4092_s3 + $0x568] sm:$0xff]  ;;  %v389_v61 = vld [vmem:[%s4092_s3 + $0xae0] sm:$0xff] }
  0x49   :  { %637 = vmatpush.msrb.mxu3 %v170_v63  ;;  %682 = vmatpush.msrb.mxu2 %v66_v0  ;;  %v193_v63 = vld [vmem:[%s4092_s3 + $0x4c0] sm:$0xff] }
  0x4a   :  { %948 = vmatpush.msra.mxu1 %v367_v62  ;;  %837 = vmatpush.msrb.mxu0 %v175_v1  ;;  %v52_v62 = vld [vmem:[%s4092_s3 + $0x58] sm:$0xff]  ;;  %v433_v0 = vld [vmem:[%s4092_s3 + $0xc40] sm:$0x1] }
  0x4b   :  { %638 = vmatpush.msrb.mxu3 %v149_v4  ;;  %683 = vmatpush.msrb.mxu2 %v45_v5  ;;  %v369_v1 = vld [vmem:[%s4092_s3 + $0xa40] sm:$0xff]  ;;  %v172_v4 = vld [vmem:[%s4092_s3 + $0x418] sm:$0xff] }
  0x4c   :  { %949 = vmatpush.msra.mxu1 %v346_v3  ;;  %838 = vmatpush.msrb.mxu0 %v154_v6  ;;  %v135_v3 = vld [vmem:[%s4092_s3 + $0x2f0] sm:$0xff]  ;;  %v348_v5 = vld [vmem:[%s4092_s3 + $0x998] sm:$0xff] }
  0x4d   :  { %684 = vmatmul.f32.vlgmr.msrb.gmra.mxu2 %v2457_v2  ;;  %639 = vmatpush.msrb.mxu3 %v128_v9  ;;  %v412_v6 = vld [vmem:[%s4092_s3 + $0xb98] sm:$0xff]  ;;  %v327_v9 = vld [vmem:[%s4092_s3 + $0x8f0] sm:$0xff] }
  0x4e   :  { %950 = vmatpush.msra.mxu1 %v325_v7  ;;  %2047 = vmatpush.msk.msra.mxu2 %vm444_vm0, %v428_v8  ;;  %v114_v7 = vld [vmem:[%s4092_s3 + $0x248] sm:$0xff]  ;;  %v151_v8 = vld [vmem:[%s4092_s3 + $0x370] sm:$0xff] }
  0x4f   :  { %839 = vmatpush.msrb.mxu0 %v133_v10  ;;  %640 = vmatpush.msrb.mxu3 %v107_v14  ;;  %v391_v10 = vld [vmem:[%s4092_s3 + $0xaf0] sm:$0xff]  ;;  %v130_v14 = vld [vmem:[%s4092_s3 + $0x2c8] sm:$0xff] }
  0x50   :  { %951 = vmatpush.msra.mxu1 %v304_v11  ;;  %2044 = vmatmul.msk.f32.vlgmr.msra.gmra.mxu0 %vm440_vm1, %v2284_v12  ;;  %v93_v11 = vld [vmem:[%s4092_s3 + $0x1a0] sm:$0xff] }
  0x51   :  { %902 = vmatpush.msra.mxu2 %v407_v13  ;;  %840 = vmatpush.msrb.mxu0 %v112_v15  ;;  %v371_v13 = vld [vmem:[%s4092_s3 + $0xa50] sm:$0xff]  ;;  %v306_v15 = vld [vmem:[%s4092_s3 + $0x848] sm:$0xff] }
  0x52   :  { %952 = vmatpush.msra.mxu1 %v283_v16  ;;  %641 = vmatpush.msrb.mxu3 %v86_v18  ;;  %v72_v16 = vld [vmem:[%s4092_s3 + $0xf8] sm:$0xff]  ;;  %v109_v18 = vld [vmem:[%s4092_s3 + $0x220] sm:$0xff] }
  0x53   :  { %903 = vmatpush.msra.mxu2 %v386_v17  ;;  %841 = vmatpush.msrb.mxu0 %v91_v19  ;;  %v350_v17 = vld [vmem:[%s4092_s3 + $0x9a8] sm:$0xff]  ;;  %v285_v19 = vld [vmem:[%s4092_s3 + $0x7a0] sm:$0xff] }
  0x54   :  { %953 = vmatpush.msra.mxu1 %v262_v21  ;;  %642 = vmatpush.msrb.mxu3 %v65_v22  ;;  %v329_v21 = vld [vmem:[%s4092_s3 + $0x900] sm:$0xff]  ;;  %v88_v22 = vld [vmem:[%s4092_s3 + $0x178] sm:$0xff] }
  0x55   :  { %908 = vmatpush.msrb.mxu2 %v366_v20  ;;  %842 = vmatpush.msrb.mxu0 %v70_v23  ;;  %v51_v20 = vld [vmem:[%s4092_s3 + $0x50] sm:$0xff]  ;;  %v264_v23 = vld [vmem:[%s4092_s3 + $0x6f8] sm:$0xff] }
  0x56   :  { %954 = vmatpush.msra.mxu1 %v241_v25  ;;  %643 = vmatpush.msrb.mxu3 %v44_v26  ;;  %v308_v25 = vld [vmem:[%s4092_s3 + $0x858] sm:$0xff]  ;;  %v67_v26 = vld [vmem:[%s4092_s3 + $0xd0] sm:$0xff] }
  0x57   :  { %909 = vmatpush.msrb.mxu2 %v345_v24  ;;  %843 = vmatpush.msrb.mxu0 %v49_v27  ;;  %v432_v24 = vld [vmem:[%s4092_s3 + $0xc38] sm:$0x1]  ;;  %v243_v27 = vld [vmem:[%s4092_s3 + $0x650] sm:$0xff] }
  0x58   :  { %955 = vmatpush.msra.mxu1 %v220_v29  ;;  %644 = vmatmul.f32.vlgmr.msrb.gmra.mxu3 %v2457_v2  ;;  %v287_v29 = vld [vmem:[%s4092_s3 + $0x7b0] sm:$0xff] }
  0x59   :  { %910 = vmatpush.msrb.mxu2 %v324_v28  ;;  %844 = vmatmul.f32.vlgmr.msrb.gmra.mxu0 %v2457_v2  ;;  %v411_v28 = vld [vmem:[%s4092_s3 + $0xb90] sm:$0xff] }
  0x5a   :  { %708 = vmatpush.msra.mxu3 %v361_v30  ;;  %2045 = vmatpush.msk.msra.mxu0 %vm444_vm0, %v427_v31  ;;  %v46_v30 = vld [vmem:[%s4092_s3 + $0x28] sm:$0xff] }
  0x5b   :  { %911 = vmatpush.msrb.mxu2 %v303_v32  ;;  %956 = vmatpush.msra.mxu1 %v199_v33  ;;  %v222_v31 = vld [vmem:[%s4092_s3 + $0x5a8] sm:$0xff] }
  0x5c   :  { %709 = vmatpush.msra.mxu3 %v340_v34  ;;  %862 = vmatpush.msra.mxu0 %v406_v35  ;;  %v390_v32 = vld [vmem:[%s4092_s3 + $0xae8] sm:$0xff] }
  0x5d   :  { %912 = vmatpush.msrb.mxu2 %v282_v36  ;;  %957 = vmatpush.msra.mxu1 %v178_v37  ;;  %v362_v33 = vld [vmem:[%s4092_s3 + $0xa08] sm:$0xff]  ;;  %v201_v36 = vld [vmem:[%s4092_s3 + $0x500] sm:$0xff] }
  0x5e   :  { %710 = vmatpush.msra.mxu3 %v319_v38  ;;  %863 = vmatpush.msra.mxu0 %v385_v39  ;;  %v370_v34 = vld [vmem:[%s4092_s3 + $0xa48] sm:$0xff]  ;;  %v341_v37 = vld [vmem:[%s4092_s3 + $0x960] sm:$0xff] }
  0x5f   :  { %913 = vmatpush.msrb.mxu2 %v261_v40  ;;  %958 = vmatpush.msra.mxu1 %v157_v41  ;;  %v266_v35 = vld [vmem:[%s4092_s3 + $0x708] sm:$0xff]  ;;  %v349_v38 = vld [vmem:[%s4092_s3 + $0x9a0] sm:$0xff]  ;;  %v180_v40 = vld [vmem:[%s4092_s3 + $0x458] sm:$0xff] }
  0x60   :  { %711 = vmatpush.msra.mxu3 %v298_v42  ;;  %2051 = vmatpush.msk.msrb.mxu0 %vm444_vm0, %v430_v43  ;;  %v245_v39 = vld [vmem:[%s4092_s3 + $0x660] sm:$0xff]  ;;  %v320_v41 = vld [vmem:[%s4092_s3 + $0x8b8] sm:$0xff] }
  0x61   :  { %914 = vmatpush.msrb.mxu2 %v240_v44  ;;  %959 = vmatpush.msra.mxu1 %v136_v45  ;;  %v328_v42 = vld [vmem:[%s4092_s3 + $0x8f8] sm:$0xff]  ;;  %v159_v44 = vld [vmem:[%s4092_s3 + $0x3b0] sm:$0xff] }
  0x62   :  { %712 = vmatpush.msra.mxu3 %v277_v46  ;;  %2046 = vmatmul.msk.f32.vlgmr.msra.gmra.mxu0 %vm440_vm1, %v2284_v12  ;;  %v224_v43 = vld [vmem:[%s4092_s3 + $0x5b8] sm:$0xff]  ;;  %v299_v45 = vld [vmem:[%s4092_s3 + $0x810] sm:$0xff] }
  0x63   :  { %982 = vmatpush.msrb.mxu0 %v409_v47  ;;  %915 = vmatpush.msrb.mxu2 %v219_v48  ;;  %v307_v46 = vld [vmem:[%s4092_s3 + $0x850] sm:$0xff]  ;;  %v138_v48 = vld [vmem:[%s4092_s3 + $0x308] sm:$0xff] }
  0x64   :  { %960 = vmatpush.msra.mxu1 %v115_v49  ;;  %713 = vmatpush.msra.mxu3 %v256_v50  ;;  %v203_v47 = vld [vmem:[%s4092_s3 + $0x510] sm:$0xff]  ;;  %v278_v49 = vld [vmem:[%s4092_s3 + $0x768] sm:$0xff] }
  0x65   :  { %983 = vmatpush.msrb.mxu0 %v388_v51  ;;  %916 = vmatpush.msrb.mxu2 %v198_v52  ;;  %v286_v50 = vld [vmem:[%s4092_s3 + $0x7a8] sm:$0xff]  ;;  %v117_v52 = vld [vmem:[%s4092_s3 + $0x260] sm:$0xff] }
  0x66   :  { %961 = vmatpush.msra.mxu1 %v94_v53  ;;  %714 = vmatpush.msra.mxu3 %v235_v55  ;;  %v182_v51 = vld [vmem:[%s4092_s3 + $0x468] sm:$0xff]  ;;  %v257_v53 = vld [vmem:[%s4092_s3 + $0x6c0] sm:$0xff] }
  0x67   :  { %2053 = vmatpush.msk.msra.mxu0 %vm444_vm0, %v431_v54  ;;  %917 = vmatpush.msrb.mxu2 %v177_v56  ;;  %v265_v54 = vld [vmem:[%s4092_s3 + $0x700] sm:$0xff]  ;;  %v96_v56 = vld [vmem:[%s4092_s3 + $0x1b8] sm:$0xff] }
  0x68   :  { %2050 = vmatmul.msk.f32.vlgmr.msrb.gmra.mxu1 %vm440_vm1, %v2284_v12  ;;  %715 = vmatpush.msra.mxu3 %v214_v59  ;;  %v161_v55 = vld [vmem:[%s4092_s3 + $0x3c0] sm:$0xff]  ;;  %v140_v59 = vld [vmem:[%s4092_s3 + $0x318] sm:$0xff] }
  0x69   :  { %1022 = vmatpush.msra.mxu0 %v410_v57  ;;  %962 = vmatpush.msra.mxu1 %v73_v58  ;;  %v236_v57 = vld [vmem:[%s4092_s3 + $0x618] sm:$0xff] }
  0x6a   :  { %918 = vmatpush.msrb.mxu2 %v156_v60  ;;  %716 = vmatpush.msra.mxu3 %v193_v63  ;;  %v244_v58 = vld [vmem:[%s4092_s3 + $0x658] sm:$0xff]  ;;  %v75_v60 = vld [vmem:[%s4092_s3 + $0x110] sm:$0xff] }
  0x6b   :  { %1023 = vmatpush.msra.mxu0 %v389_v61  ;;  %963 = vmatpush.msra.mxu1 %v52_v62  ;;  %v215_v61 = vld [vmem:[%s4092_s3 + $0x570] sm:$0xff] }
  0x6c   :  { %2052 = vmatmul.msk.f32.vlgmr.msrb.gmra.mxu0 %vm440_vm1, %v2284_v12  ;;  %919 = vmatpush.msrb.mxu2 %v135_v3  ;;  %v223_v62 = vld [vmem:[%s4092_s3 + $0x5b0] sm:$0xff]  ;;  %v202_v3 = vld [vmem:[%s4092_s3 + $0x508] sm:$0xff] }
  0x6d   :  { %2057 = vmatpush.msk.msrb.mxu1 %vm444_vm0, %v433_v0  ;;  %1028 = vmatpush.msrb.mxu0 %v369_v1  ;;  %v119_v63 = vld [vmem:[%s4092_s3 + $0x270] sm:$0xff]  ;;  %v54_v0 = vld [vmem:[%s4092_s3 + $0x68] sm:$0xff] }
  0x6e   :  { %717 = vmatpush.msra.mxu3 %v172_v4  ;;  %2048 = vmatmul.msk.f32.vlgmr.msra.gmra.mxu2 %vm440_vm1, %v2284_v12  ;;  %v194_v1 = vld [vmem:[%s4092_s3 + $0x4c8] sm:$0xff] }
  0x6f   :  { %1029 = vmatpush.msrb.mxu0 %v348_v5  ;;  %1102 = vmatpush.msrb.mxu1 %v412_v6  ;;  %v98_v4 = vld [vmem:[%s4092_s3 + $0x1c8] sm:$0xff]  ;;  %v173_v5 = vld [vmem:[%s4092_s3 + $0x420] sm:$0xff] }
  0x70   :  { %920 = vmatpush.msrb.mxu2 %v114_v7  ;;  %718 = vmatpush.msra.mxu3 %v151_v8  ;;  %v181_v6 = vld [vmem:[%s4092_s3 + $0x460] sm:$0xff]  ;;  %v414_v8 = vld [vmem:[%s4092_s3 + $0xba8] sm:$0xff] }
  0x71   :  { %1030 = vmatpush.msrb.mxu0 %v327_v9  ;;  %1103 = vmatpush.msrb.mxu1 %v391_v10  ;;  %v77_v7 = vld [vmem:[%s4092_s3 + $0x120] sm:$0xff]  ;;  %v152_v9 = vld [vmem:[%s4092_s3 + $0x378] sm:$0xff] }
  0x72   :  { %921 = vmatpush.msrb.mxu2 %v93_v11  ;;  %964 = vmatmul.f32.vlgmr.msra.gmra.mxu1 %v2457_v2  ;;  %v160_v10 = vld [vmem:[%s4092_s3 + $0x3b8] sm:$0xff]  ;;  %v3088_v11 = vld [vmem:[%s4089_s0 + $0x8] sm:$0xff] }
  0x73   :  { %1108 = vmatpush.msra.mxu1 %v371_v13  ;;  %719 = vmatpush.msra.mxu3 %v130_v14  ;;  %v56_v13 = vld [vmem:[%s4092_s3 + $0x78] sm:$0xff]  ;;  %v393_v14 = vld [vmem:[%s4092_s3 + $0xb00] sm:$0xff] }
  0x74   :  { %1031 = vmatpush.msrb.mxu0 %v306_v15  ;;  %922 = vmatpush.msrb.mxu2 %v72_v16  ;;  %v437_v15 = vld [vmem:[%s4092_s3 + $0xc60] sm:$0x1] }
  0x75   :  { %1109 = vmatpush.msra.mxu1 %v350_v17  ;;  %720 = vmatpush.msra.mxu3 %v109_v18  ;;  %v373_v16 = vld [vmem:[%s4092_s3 + $0xa60] sm:$0xff]  ;;  %v131_v17 = vld [vmem:[%s4092_s3 + $0x2d0] sm:$0xff] }
  0x76   :  { %1032 = vmatpush.msrb.mxu0 %v285_v19  ;;  %923 = vmatpush.msrb.mxu2 %v51_v20  ;;  %v139_v18 = vld [vmem:[%s4092_s3 + $0x310] sm:$0xff]  ;;  %v416_v19 = vld [vmem:[%s4092_s3 + $0xbb8] sm:$0xff] }
  0x77   :  { %1110 = vmatpush.msra.mxu1 %v329_v21  ;;  %721 = vmatpush.msra.mxu3 %v88_v22  ;;  %v352_v20 = vld [vmem:[%s4092_s3 + $0x9b8] sm:$0xff]  ;;  %v110_v21 = vld [vmem:[%s4092_s3 + $0x228] sm:$0xff] }
  0x78   :  { %924 = vmatmul.f32.vlgmr.msrb.gmra.mxu2 %v2457_v2  ;;  %1033 = vmatpush.msrb.mxu0 %v264_v23  ;;  %v118_v22 = vld [vmem:[%s4092_s3 + $0x268] sm:$0xff]  ;;  %v331_v23 = vld [vmem:[%s4092_s3 + $0x910] sm:$0xff] }
  0x79   :  { %2055 = vmatpush.msk.msra.mxu2 %vm444_vm0, %v432_v24  ;;  %1111 = vmatpush.msra.mxu1 %v308_v25  ;;  %v395_v24 = vld [vmem:[%s4092_s3 + $0xb10] sm:$0xff]  ;;  %v89_v25 = vld [vmem:[%s4092_s3 + $0x180] sm:$0xff] }
  0x7a   :  { %722 = vmatpush.msra.mxu3 %v67_v26  ;;  %1034 = vmatpush.msrb.mxu0 %v243_v27  ;;  %v97_v26 = vld [vmem:[%s4092_s3 + $0x1c0] sm:$0xff]  ;;  %v310_v27 = vld [vmem:[%s4092_s3 + $0x868] sm:$0xff] }
  0x7b   :  { %1062 = vmatpush.msra.mxu2 %v411_v28  ;;  %1112 = vmatpush.msra.mxu1 %v287_v29  ;;  %v375_v28 = vld [vmem:[%s4092_s3 + $0xa70] sm:$0xff]  ;;  %v68_v29 = vld [vmem:[%s4092_s3 + $0xd8] sm:$0xff] }
  0x7c   :  { %723 = vmatpush.msra.mxu3 %v46_v30  ;;  %1035 = vmatpush.msrb.mxu0 %v222_v31  ;;  %v76_v30 = vld [vmem:[%s4092_s3 + $0x118] sm:$0xff]  ;;  %v289_v31 = vld [vmem:[%s4092_s3 + $0x7c0] sm:$0xff] }
  0x7d   :  { %1063 = vmatpush.msra.mxu2 %v390_v32  ;;  %724 = vmatmul.f32.vlgmr.msra.gmra.mxu3 %v2457_v2  ;;  %v354_v32 = vld [vmem:[%s4092_s3 + $0x9c8] sm:$0xff] }
  0x7e   :  { %748 = vmatpush.msrb.mxu3 %v362_v33  ;;  %1113 = vmatpush.msra.mxu1 %v266_v35  ;;  %v47_v33 = vld [vmem:[%s4092_s3 + $0x30] sm:$0xff]  ;;  %v333_v35 = vld [vmem:[%s4092_s3 + $0x920] sm:$0xff] }
  0x7f   :  { %1068 = vmatpush.msrb.mxu2 %v370_v34  ;;  %1036 = vmatpush.msrb.mxu0 %v201_v36  ;;  %v55_v34 = vld [vmem:[%s4092_s3 + $0x70] sm:$0xff]  ;;  %v365_v36 = vld [vmem:[%s4092_s3 + $0xa20] sm:$0xff] }
  0x80   :  { %749 = vmatpush.msrb.mxu3 %v341_v37  ;;  %1114 = vmatpush.msra.mxu1 %v245_v39  ;;  %v268_v37 = vld [vmem:[%s4092_s3 + $0x718] sm:$0xff] }
  0x81   :  { %1069 = vmatpush.msrb.mxu2 %v349_v38  ;;  %1037 = vmatpush.msrb.mxu0 %v180_v40  ;;  %v436_v38 = vld [vmem:[%s4092_s3 + $0xc58] sm:$0x1] }
  0x82   :  { %750 = vmatpush.msrb.mxu3 %v320_v41  ;;  %1115 = vmatpush.msra.mxu1 %v224_v43  ;;  %v312_v39 = vld [vmem:[%s4092_s3 + $0x878] sm:$0xff]  ;;  %v247_v41 = vld [vmem:[%s4092_s3 + $0x670] sm:$0xff] }
  0x83   :  { %1070 = vmatpush.msrb.mxu2 %v328_v42  ;;  %1038 = vmatpush.msrb.mxu0 %v159_v44  ;;  %v344_v40 = vld [vmem:[%s4092_s3 + $0x978] sm:$0xff]  ;;  %v415_v42 = vld [vmem:[%s4092_s3 + $0xbb0] sm:$0xff] }
  0x84   :  { %751 = vmatpush.msrb.mxu3 %v299_v45  ;;  %1116 = vmatpush.msra.mxu1 %v203_v47  ;;  %v291_v43 = vld [vmem:[%s4092_s3 + $0x7d0] sm:$0xff]  ;;  %v394_v45 = vld [vmem:[%s4092_s3 + $0xb08] sm:$0xff] }
  0x85   :  { %1071 = vmatpush.msrb.mxu2 %v307_v46  ;;  %1039 = vmatpush.msrb.mxu0 %v138_v48  ;;  %v323_v44 = vld [vmem:[%s4092_s3 + $0x8d0] sm:$0xff]  ;;  %v270_v46 = vld [vmem:[%s4092_s3 + $0x728] sm:$0xff] }
  0x86   :  { %752 = vmatpush.msrb.mxu3 %v278_v49  ;;  %1117 = vmatpush.msra.mxu1 %v182_v51  ;;  %v374_v47 = vld [vmem:[%s4092_s3 + $0xa68] sm:$0xff]  ;;  %v205_v49 = vld [vmem:[%s4092_s3 + $0x520] sm:$0xff] }
  0x87   :  { %1072 = vmatpush.msrb.mxu2 %v286_v50  ;;  %1040 = vmatpush.msrb.mxu0 %v117_v52  ;;  %v302_v48 = vld [vmem:[%s4092_s3 + $0x828] sm:$0xff]  ;;  %v249_v50 = vld [vmem:[%s4092_s3 + $0x680] sm:$0xff] }
  0x88   :  { %753 = vmatpush.msrb.mxu3 %v257_v53  ;;  %1118 = vmatpush.msra.mxu1 %v161_v55  ;;  %v353_v51 = vld [vmem:[%s4092_s3 + $0x9c0] sm:$0xff]  ;;  %v184_v53 = vld [vmem:[%s4092_s3 + $0x478] sm:$0xff] }
  0x89   :  { %1073 = vmatpush.msrb.mxu2 %v265_v54  ;;  %1041 = vmatpush.msrb.mxu0 %v96_v56  ;;  %v281_v52 = vld [vmem:[%s4092_s3 + $0x780] sm:$0xff]  ;;  %v228_v54 = vld [vmem:[%s4092_s3 + $0x5d8] sm:$0xff] }
  0x8a   :  { %754 = vmatpush.msrb.mxu3 %v236_v57  ;;  %1119 = vmatpush.msra.mxu1 %v140_v59  ;;  %v332_v55 = vld [vmem:[%s4092_s3 + $0x918] sm:$0xff]  ;;  %v207_v59 = vld [vmem:[%s4092_s3 + $0x530] sm:$0xff] }
  0x8b   :  { %1074 = vmatpush.msrb.mxu2 %v244_v58  ;;  %2054 = vmatmul.msk.f32.vlgmr.msra.gmra.mxu0 %vm440_vm1, %v2284_v12  ;;  %v435_v12 = vld [vmem:[%s4092_s3 + $0xc50] sm:$0x1]  ;;  %v260_v56 = vld [vmem:[%s4092_s3 + $0x6d8] sm:$0xff] }
  0x8c   :  { %1042 = vmatpush.msrb.mxu0 %v75_v60  ;;  %755 = vmatpush.msrb.mxu3 %v215_v61  ;;  %v163_v58 = vld [vmem:[%s4092_s3 + $0x3d0] sm:$0xff] }
  0x8d   :  { %1075 = vmatpush.msrb.mxu2 %v223_v62  ;;  %1120 = vmatpush.msra.mxu1 %v119_v63  ;;  %v311_v60 = vld [vmem:[%s4092_s3 + $0x870] sm:$0xff]  ;;  %v142_v62 = vld [vmem:[%s4092_s3 + $0x328] sm:$0xff] }
  0x8e   :  { %1043 = vmatpush.msrb.mxu0 %v54_v0  ;;  %756 = vmatpush.msrb.mxu3 %v194_v1  ;;  %v239_v61 = vld [vmem:[%s4092_s3 + $0x630] sm:$0xff]  ;;  %v186_v63 = vld [vmem:[%s4092_s3 + $0x488] sm:$0xff] }
  0x8f   :  { %1076 = vmatpush.msrb.mxu2 %v202_v3  ;;  %1121 = vmatpush.msra.mxu1 %v98_v4  ;;  %v290_v0 = vld [vmem:[%s4092_s3 + $0x7c8] sm:$0xff]  ;;  %v121_v3 = vld [vmem:[%s4092_s3 + $0x280] sm:$0xff] }
  0x90   :  { %2061 = vmatpush.msk.msra.mxu0 %vm444_vm0, %v435_v12  ;;  %757 = vmatpush.msrb.mxu3 %v173_v5  ;;  %v218_v1 = vld [vmem:[%s4092_s3 + $0x588] sm:$0xff]  ;;  %v269_v4 = vld [vmem:[%s4092_s3 + $0x720] sm:$0xff] }
  0x91   :  { %1077 = vmatpush.msrb.mxu2 %v181_v6  ;;  %2058 = vmatmul.msk.f32.vlgmr.msrb.gmra.mxu1 %vm440_vm1, %v3088_v11  ;;  %v165_v12 = vld [vmem:[%s4092_s3 + $0x3e0] sm:$0xff]  ;;  %v100_v6 = vld [vmem:[%s4092_s3 + $0x1d8] sm:$0xff] }
  0x92   :  { %1122 = vmatpush.msra.mxu1 %v77_v7  ;;  %1182 = vmatpush.msra.mxu0 %v414_v8  ;;  %v197_v5 = vld [vmem:[%s4092_s3 + $0x4e0] sm:$0xff]  ;;  %v248_v7 = vld [vmem:[%s4092_s3 + $0x678] sm:$0xff] }
  0x93   :  { %758 = vmatpush.msrb.mxu3 %v152_v9  ;;  %1078 = vmatpush.msrb.mxu2 %v160_v10  ;;  %v144_v8 = vld [vmem:[%s4092_s3 + $0x338] sm:$0xff]  ;;  %v79_v10 = vld [vmem:[%s4092_s3 + $0x130] sm:$0xff] }
  0x94   :  { %1123 = vmatpush.msra.mxu1 %v56_v13  ;;  %1183 = vmatpush.msra.mxu0 %v393_v14  ;;  %v176_v9 = vld [vmem:[%s4092_s3 + $0x438] sm:$0xff]  ;;  %v227_v14 = vld [vmem:[%s4092_s3 + $0x5d0] sm:$0xff] }
  0x95   :  { %1044 = vmatmul.f32.vlgmr.msrb.gmra.mxu0 %v2457_v2  ;;  %759 = vmatpush.msrb.mxu3 %v131_v17  ;;  %v58_v17 = vld [vmem:[%s4092_s3 + $0x88] sm:$0xff] }
  0x96   :  { %2065 = vmatpush.msk.msrb.mxu1 %vm444_vm0, %v437_v15  ;;  %1188 = vmatpush.msrb.mxu0 %v373_v16  ;;  %v123_v15 = vld [vmem:[%s4092_s3 + $0x290] sm:$0xff] }
  0x97   :  { %1079 = vmatpush.msrb.mxu2 %v139_v18  ;;  %760 = vmatpush.msrb.mxu3 %v110_v21  ;;  %v155_v16 = vld [vmem:[%s4092_s3 + $0x390] sm:$0xff]  ;;  %v206_v18 = vld [vmem:[%s4092_s3 + $0x528] sm:$0xff]  ;;  %v185_v21 = vld [vmem:[%s4092_s3 + $0x480] sm:$0xff] }
  0x98   :  { %1262 = vmatpush.msrb.mxu1 %v416_v19  ;;  %2056 = vmatmul.msk.f32.vlgmr.msra.gmra.mxu2 %vm440_vm1, %v3088_v11  ;;  %v102_v19 = vld [vmem:[%s4092_s3 + $0x1e8] sm:$0xff] }
  0x99   :  { %1189 = vmatpush.msrb.mxu0 %v352_v20  ;;  %1080 = vmatpush.msrb.mxu2 %v118_v22  ;;  %v134_v20 = vld [vmem:[%s4092_s3 + $0x2e8] sm:$0xff]  ;;  %v81_v22 = vld [vmem:[%s4092_s3 + $0x140] sm:$0xff] }
  0x9a   :  { %1263 = vmatpush.msrb.mxu1 %v395_v24  ;;  %761 = vmatpush.msrb.mxu3 %v89_v25  ;;  %v3325_v24 = vld [vmem:[%s4089_s0] sm:$0xff] }
  0x9b   :  { %1190 = vmatpush.msrb.mxu0 %v331_v23  ;;  %1081 = vmatpush.msrb.mxu2 %v97_v26  ;;  %v439_v23 = vld [vmem:[%s4092_s3 + $0xc70] sm:$0x1]  ;;  %v113_v25 = vld [vmem:[%s4092_s3 + $0x240] sm:$0xff]  ;;  %v164_v26 = vld [vmem:[%s4092_s3 + $0x3d8] sm:$0xff] }
  0x9c   :  { %1124 = vmatmul.f32.vlgmr.msra.gmra.mxu1 %v2457_v2  ;;  %762 = vmatpush.msrb.mxu3 %v68_v29  ;;  %v92_v29 = vld [vmem:[%s4092_s3 + $0x198] sm:$0xff] }
  0x9d   :  { %1191 = vmatpush.msrb.mxu0 %v310_v27  ;;  %1268 = vmatpush.msra.mxu1 %v375_v28  ;;  %v60_v27 = vld [vmem:[%s4092_s3 + $0x98] sm:$0xff]  ;;  %v418_v28 = vld [vmem:[%s4092_s3 + $0xbc8] sm:$0xff] }
  0x9e   :  { %1082 = vmatpush.msrb.mxu2 %v76_v30  ;;  %763 = vmatpush.msrb.mxu3 %v47_v33  ;;  %v143_v30 = vld [vmem:[%s4092_s3 + $0x330] sm:$0xff] }
  0x9f   :  { %1192 = vmatpush.msrb.mxu0 %v289_v31  ;;  %1269 = vmatpush.msra.mxu1 %v354_v32  ;;  %v397_v31 = vld [vmem:[%s4092_s3 + $0xb20] sm:$0xff]  ;;  %v71_v33 = vld [vmem:[%s4092_s3 + $0xf0] sm:$0xff] }
  0xa0   :  { %1083 = vmatpush.msrb.mxu2 %v55_v34  ;;  %764 = vmatmul.f32.vlgmr.msrb.gmra.mxu3 %v2457_v2 }
  0xa1   :  { %1270 = vmatpush.msra.mxu1 %v333_v35  ;;  %868 = vmatpush.msra.mxu3 %v365_v36  ;;  %v122_v35 = vld [vmem:[%s4092_s3 + $0x288] sm:$0xff]  ;;  %v1442_v36 = vld [vmem:[#allocation2 + $0x80] sm:$0x1] }
  0xa2   :  { %1084 = vmatmul.f32.vlgmr.msrb.gmra.mxu2 %v2457_v2  ;;  %1193 = vmatpush.msrb.mxu0 %v268_v37  ;;  %v226_v2 = vld [vmem:[%s4092_s3 + $0x5c8] sm:$0xff] }
  0xa3   :  { %2063 = vmatpush.msk.msra.mxu2 %vm444_vm0, %v436_v38  ;;  %1271 = vmatpush.msra.mxu1 %v312_v39  ;;  %v50_v37 = vld [vmem:[%s4092_s3 + $0x48] sm:$0xff]  ;;  %v101_v38 = vld [vmem:[%s4092_s3 + $0x1e0] sm:$0xff]  ;;  %v368_v39 = vld [vmem:[%s4092_s3 + $0xa38] sm:$0xff] }
  0xa4   :  { %869 = vmatpush.msra.mxu3 %v344_v40  ;;  %1194 = vmatpush.msrb.mxu0 %v247_v41  ;;  %v1435_v40 = vld [vmem:[#allocation2 + $0x48] sm:$0xff]  ;;  %v1440_v41 = vld [vmem:[#allocation2 + $0x70] sm:$0x1] }
  0xa5   :  { %1222 = vmatpush.msra.mxu2 %v415_v42  ;;  %1272 = vmatpush.msra.mxu1 %v291_v43  ;;  %v80_v42 = vld [vmem:[%s4092_s3 + $0x138] sm:$0xff]  ;;  %v347_v43 = vld [vmem:[%s4092_s3 + $0x990] sm:$0xff] }
  0xa6   :  { %870 = vmatpush.msra.mxu3 %v323_v44  ;;  %1195 = vmatpush.msrb.mxu0 %v226_v2  ;;  %v1428_v44 = vld [vmem:[#allocation2 + $0x10] sm:$0xff]  ;;  %v1433_v2 = vld [vmem:[#allocation2 + $0x38] sm:$0xff] }
  0xa7   :  { %1223 = vmatpush.msra.mxu2 %v394_v45  ;;  %1273 = vmatpush.msra.mxu1 %v270_v46  ;;  %v3383_v45 = vld [vmem:[%s4090_s1] sm:$0xff]  ;;  %v326_v46 = vld [vmem:[%s4092_s3 + $0x8e8] sm:$0xff] }
  0xa8   :  { %871 = vmatpush.msra.mxu3 %v302_v48  ;;  %1196 = vmatpush.msrb.mxu0 %v205_v49  ;;  %v3235_v57 = vpop.f32.mrf.mxu3  ;;  %v1426_v48 = vld [vmem:[#allocation2] sm:$0xff] }
  0xa9   :  { %1228 = vmatpush.msrb.mxu2 %v374_v47  ;;  %1274 = vmatpush.msra.mxu1 %v249_v50  ;;  %v59_v47 = vld [vmem:[%s4092_s3 + $0x90] sm:$0xff]  ;;  %v305_v49 = vld [vmem:[%s4092_s3 + $0x840] sm:$0xff]  ;;  %v1441_v50 = vld [vmem:[#allocation2 + $0x78] sm:$0x1] }
  0xaa   :  { %872 = vmatpush.msra.mxu3 %v281_v52  ;;  %1197 = vmatpush.msrb.mxu0 %v184_v53  ;;  %v284_v52 = vld [vmem:[%s4092_s3 + $0x798] sm:$0xff]  ;;  %v1446_v53 = vld [vmem:[#allocation2 + $0xa0] sm:$0x1] }
  0xab   :  { %1229 = vmatpush.msrb.mxu2 %v353_v51  ;;  %1275 = vmatpush.msra.mxu1 %v228_v54  ;;  %v1444_v51 = vld [vmem:[#allocation2 + $0x90] sm:$0x1]  ;;  %v1434_v54 = vld [vmem:[#allocation2 + $0x40] sm:$0xff] }
  0xac   :  { %873 = vmatpush.msra.mxu3 %v260_v56  ;;  %1198 = vmatpush.msrb.mxu0 %v163_v58  ;;  %v3411_v56 = vld [vmem:[%s4090_s1 + $0x8] sm:$0xff] }
  0xad   :  { %1230 = vmatpush.msrb.mxu2 %v332_v55  ;;  %1276 = vmatpush.msra.mxu1 %v207_v59  ;;  %v263_v55 = vld [vmem:[%s4092_s3 + $0x6f0] sm:$0xff]  ;;  %v1427_v58 = vld [vmem:[#allocation2 + $0x8] sm:$0xff] }
  0xae   :  { %874 = vmatpush.msra.mxu3 %v239_v61  ;;  %1199 = vmatpush.msrb.mxu0 %v142_v62  ;;  %v242_v59 = vld [vmem:[%s4092_s3 + $0x648] sm:$0xff]  ;;  %v221_v61 = vld [vmem:[%s4092_s3 + $0x5a0] sm:$0xff]  ;;  %v200_v62 = vld [vmem:[%s4092_s3 + $0x4f8] sm:$0xff] }
  0xaf   :  { %1231 = vmatpush.msrb.mxu2 %v311_v60  ;;  %1277 = vmatpush.msra.mxu1 %v186_v63  ;;  %v1445_v60 = vld [vmem:[#allocation2 + $0x98] sm:$0x1]  ;;  %v179_v63 = vld [vmem:[%s4092_s3 + $0x450] sm:$0xff] }
  0xb0   :  { %2062 = vmatmul.msk.f32.vlgmr.msra.gmra.mxu0 %vm440_vm1, %v3088_v11  ;;  %875 = vmatpush.msra.mxu3 %v218_v1  ;;  %v3436_v1 = vld [vmem:[%s4090_s1 + $0x10] sm:$0xff] }
  0xb1   :  { %1232 = vmatpush.msrb.mxu2 %v290_v0  ;;  %1200 = vmatpush.msrb.mxu0 %v121_v3  ;;  %v1438_v0 = vld [vmem:[#allocation2 + $0x60] sm:$0xff]  ;;  %v158_v3 = vld [vmem:[%s4092_s3 + $0x3a8] sm:$0xff] }
  0xb2   :  { %1278 = vmatpush.msra.mxu1 %v165_v12  ;;  %v605_v13 = vpop.f32.mrf.mxu3  ;;  %876 = vmatpush.msra.mxu3 %v197_v5  ;;  %v116_v12 = vld [vmem:[%s4092_s3 + $0x258] sm:$0xff] }
  0xb3   :  { %1233 = vmatpush.msrb.mxu2 %v269_v4  ;;  %1201 = vmatpush.msrb.mxu0 %v100_v6  ;;  %v137_v4 = vld [vmem:[%s4092_s3 + $0x300] sm:$0xff]  ;;  %v1437_v5 = vld [vmem:[#allocation2 + $0x58] sm:$0xff]  ;;  %v1439_v6 = vld [vmem:[#allocation2 + $0x68] sm:$0xff] }
  0xb4   :  { %1279 = vmatpush.msra.mxu1 %v144_v8  ;;  %877 = vmatpush.msra.mxu3 %v176_v9  ;;  %v3459_v8 = vld [vmem:[%s4090_s1 + $0x18] sm:$0xff]  ;;  %v74_v9 = vld [vmem:[%s4092_s3 + $0x108] sm:$0xff] }
  0xb5   :  { %1234 = vmatpush.msrb.mxu2 %v248_v7  ;;  %1202 = vmatpush.msrb.mxu0 %v79_v10  ;;  %v95_v7 = vld [vmem:[%s4092_s3 + $0x1b0] sm:$0xff]  ;;  %v3464_v10 = vpop.f32.mrf.mxu1 }
  0xb6   :  { %2066 = vmatmul.msk.f32.vlgmr.msrb.gmra.mxu1 %vm440_vm1, %v3088_v11  ;;  %878 = vmatpush.msra.mxu3 %v155_v16  ;;  %v3486_v16 = vld [vmem:[%s4090_s1 + $0x20] sm:$0xff] }
  0xb7   :  { %1235 = vmatpush.msrb.mxu2 %v227_v14  ;;  %1280 = vmatpush.msra.mxu1 %v123_v15  ;;  %v434_v14 = vld [vmem:[%s4092_s3 + $0xc48] sm:$0x1]  ;;  %v413_v15 = vld [vmem:[%s4092_s3 + $0xba0] sm:$0xff] }
  0xb8   :  { %1203 = vmatpush.msrb.mxu0 %v58_v17  ;;  %879 = vmatpush.msra.mxu3 %v134_v20  ;;  %v3488_v17 = vpop.f32.mrf.mxu0  ;;  %v351_v20 = vld [vmem:[%s4092_s3 + $0x9b0] sm:$0xff] }
  0xb9   :  { %1236 = vmatpush.msrb.mxu2 %v206_v18  ;;  %1204 = vmatmul.f32.vlgmr.msrb.gmra.mxu0 %v3325_v24  ;;  %v392_v18 = vld [vmem:[%s4092_s3 + $0xaf8] sm:$0xff] }
  0xba   :  { %1281 = vmatpush.msra.mxu1 %v102_v19  ;;  %2069 = vmatpush.msk.msra.mxu0 %vm444_vm0, %v439_v23  ;;  %v372_v19 = vld [vmem:[%s4092_s3 + $0xa58] sm:$0xff]  ;;  %v309_v23 = vld [vmem:[%s4092_s3 + $0x860] sm:$0xff] }
  0xbb   :  { %1237 = vmatpush.msrb.mxu2 %v185_v21  ;;  %880 = vmatpush.msra.mxu3 %v113_v25  ;;  %v3518_v25 = vld [vmem:[%s4090_s1 + $0x28] sm:$0xff] }
  0xbc   :  { %1282 = vmatpush.msra.mxu1 %v81_v22  ;;  %v625_v32 = vpop.f32.mrf.mxu3  ;;  %1342 = vmatpush.msra.mxu0 %v418_v28  ;;  %v330_v22 = vld [vmem:[%s4092_s3 + $0x908] sm:$0xff]  ;;  %v267_v28 = vld [vmem:[%s4092_s3 + $0x710] sm:$0xff] }
  0xbd   :  { %1238 = vmatpush.msrb.mxu2 %v164_v26  ;;  %v3353_v34 = vadd.f32 %v625_v32, %v605_v13  ;;  %881 = vmatpush.msra.mxu3 %v92_v29  ;;  %v53_v13 = vld [vmem:[%s4092_s3 + $0x60] sm:$0xff]  ;;  %v3501_v21 = vpop.f32.mrf.mxu1  ;;  %v246_v29 = vld [vmem:[%s4092_s3 + $0x668] sm:$0xff]  ;;  %v3545_v32 = vld [vmem:[%s4090_s1 + $0x30] sm:$0xff] }
  0xbe   :  { %1283 = vmatpush.msra.mxu1 %v60_v27  ;;  %1343 = vmatpush.msra.mxu0 %v397_v31  ;;  %v288_v27 = vld [vmem:[%s4092_s3 + $0x7b8] sm:$0xff]  ;;  %v225_v31 = vld [vmem:[%s4092_s3 + $0x5c0] sm:$0xff] }
  0xbf   :  { %1284 = vmatmul.f32.vlgmr.msra.gmra.mxu1 %v3325_v24  ;;  %1239 = vmatpush.msrb.mxu2 %v143_v30 }
  0xc0   :  { %882 = vmatpush.msra.mxu3 %v71_v33  ;;  %2064 = vmatmul.msk.f32.vlgmr.msra.gmra.mxu2 %vm440_vm1, %v3088_v11  ;;  %v3520_v26 = vpop.f32.mrf.mxu0  ;;  %v1431_v33 = vld [vmem:[#allocation2 + $0x28] sm:$0xff] }
  0xc1   :  { %1240 = vmatpush.msrb.mxu2 %v122_v35  ;;  %2070 = vmatmul.msk.f32.vlgmr.msra.gmra.mxu0 %vm440_vm1, %v3088_v11 }
  0xc2   :  { %2097 = vmatpush.msk.msrb.mxu1 %vm444_vm0, %v1442_v36  ;;  %883 = vmatpush.msra.mxu3 %v50_v37  ;;  %v204_v36 = vld [vmem:[%s4092_s3 + $0x518] sm:$0xff]  ;;  %v183_v37 = vld [vmem:[%s4092_s3 + $0x470] sm:$0xff] }
  0xc3   :  { %884 = vmatmul.f32.vlgmr.msra.gmra.mxu3 %v3325_v24  ;;  %1241 = vmatpush.msrb.mxu2 %v101_v38  ;;  %v162_v38 = vld [vmem:[%s4092_s3 + $0x3c8] sm:$0xff] }
  0xc4   :  { %988 = vmatpush.msrb.mxu3 %v368_v39  ;;  %1624 = vmatpush.msrb.mxu1 %v1435_v40  ;;  %v1430_v39 = vld [vmem:[#allocation2 + $0x20] sm:$0xff]  ;;  %v1432_v40 = vld [vmem:[#allocation2 + $0x30] sm:$0xff] }
  0xc5   :  { %2071 = vmatpush.msk.msrb.mxu0 %vm444_vm0, %v1440_v41  ;;  %1242 = vmatpush.msrb.mxu2 %v80_v42  ;;  %v3537_v30 = vpop.f32.mrf.mxu1  ;;  %v141_v42 = vld [vmem:[%s4092_s3 + $0x320] sm:$0xff] }
  0xc6   :  { %989 = vmatpush.msrb.mxu3 %v347_v43  ;;  %1625 = vmatpush.msrb.mxu1 %v1428_v44  ;;  %v3572_v43 = vld [vmem:[%s4090_s1 + $0x38] sm:$0xff] }
  0xc7   :  { %1518 = vmatpush.msrb.mxu0 %v1433_v2  ;;  %2098 = vmatmul.msk.f32.vlgmr.msrb.gmra.mxu1 %vm440_vm1, %v3383_v45  ;;  %v120_v44 = vld [vmem:[%s4092_s3 + $0x278] sm:$0xff] }
  0xc8   :  { %990 = vmatpush.msrb.mxu3 %v326_v46  ;;  %1243 = vmatpush.msrb.mxu2 %v59_v47  ;;  %v99_v46 = vld [vmem:[%s4092_s3 + $0x1d0] sm:$0xff]  ;;  %v78_v47 = vld [vmem:[%s4092_s3 + $0x128] sm:$0xff] }
  0xc9   :  { %1244 = vmatmul.f32.vlgmr.msrb.gmra.mxu2 %v3325_v24  ;;  %1519 = vmatpush.msrb.mxu0 %v1426_v48  ;;  %v57_v48 = vld [vmem:[%s4092_s3 + $0x80] sm:$0xff] }
  0xca   :  { %991 = vmatpush.msrb.mxu3 %v305_v49  ;;  %2072 = vmatmul.msk.f32.vlgmr.msrb.gmra.mxu0 %vm440_vm1, %v3383_v45  ;;  %v3597_v49 = vld [vmem:[%s4090_s1 + $0x40] sm:$0xff] }
  0xcb   :  { %2084 = vmatpush.msk.msra.mxu2 %vm444_vm0, %v1441_v50  ;;  %2123 = vmatpush.msk.msra.mxu0 %vm444_vm0, %v1444_v51  ;;  %v438_v51 = vld [vmem:[%s4092_s3 + $0xc68] sm:$0x1] }
  0xcc   :  { %992 = vmatpush.msrb.mxu3 %v284_v52  ;;  %2149 = vmatpush.msk.msra.mxu1 %vm444_vm0, %v1446_v53  ;;  %v417_v52 = vld [vmem:[%s4092_s3 + $0xbc0] sm:$0xff] }
  0xcd   :  { %1571 = vmatpush.msra.mxu2 %v1434_v54  ;;  %1730 = vmatpush.msra.mxu0 %v1437_v5  ;;  %v3547_v35 = vpop.f32.mrf.mxu0  ;;  %v3564_v41 = vpop.f32.mrf.mxu1  ;;  %v396_v54 = vld [vmem:[%s4092_s3 + $0xb18] sm:$0xff] }
  0xce   :  { %993 = vmatpush.msrb.mxu3 %v263_v55  ;;  %1836 = vmatpush.msra.mxu1 %v1439_v6  ;;  %v376_v55 = vld [vmem:[%s4092_s3 + $0xa78] sm:$0xff]  ;;  %v250_v6 = vld [vmem:[%s4092_s3 + $0x688] sm:$0xff] }
  0xcf   :  { %2099 = vmatmul.msk.f32.gmra.mxu1 %vm440_vm1, %v3411_v56  ;;  %1572 = vmatpush.msra.mxu2 %v1427_v58  ;;  %v3626_v58 = vld [vmem:[%s4090_s1 + $0x48] sm:$0xff] }
  0xd0   :  { %994 = vmatpush.msrb.mxu3 %v242_v59  ;;  %1731 = vmatpush.msra.mxu0 %v1430_v39 }
  0xd1   :  { %2136 = vmatpush.msk.msrb.mxu2 %vm444_vm0, %v1445_v60  ;;  %1837 = vmatpush.msra.mxu1 %v1432_v40  ;;  %v355_v60 = vld [vmem:[%s4092_s3 + $0x9d0] sm:$0xff] }
  0xd2   :  { %2085 = vmatmul.msk.f32.vlgmr.msra.gmra.mxu2 %vm440_vm1, %v3383_v45  ;;  %995 = vmatpush.msrb.mxu3 %v221_v61  ;;  %v3633_v61 = vpop.f32.mrf.mxu2 }
  0xd3   :  { %2073 = vmatmul.msk.f32.gmra.mxu0 %vm440_vm1, %v3411_v56  ;;  %1783 = vmatpush.msrb.mxu2 %v1438_v0  ;;  %v313_v0 = vld [vmem:[%s4092_s3 + $0x880] sm:$0xff] }
  0xd4   :  { %996 = vmatpush.msrb.mxu3 %v200_v62  ;;  %v334_v62 = vld [vmem:[%s4092_s3 + $0x928] sm:$0xff] }
  0xd5   :  { %1784 = vmatpush.msrb.mxu2 %v1431_v33  ;;  %v3599_v50 = vpop.f32.mrf.mxu1  ;;  %v61_v33 = vld [vmem:[%s4092_s3 + $0xa0] sm:$0xff] }
  0xd6   :  { %997 = vmatpush.msrb.mxu3 %v179_v63  ;;  %v3577_v2 = vpop.f32.mrf.mxu0 }
  0xd7   :  { %2100 = vmatmul.msk.f32.gmra.mxu1 %vm440_vm1, %v3436_v1 }
  0xd8   :  { %998 = vmatpush.msrb.mxu3 %v158_v3  ;;  %v292_v3 = vld [vmem:[%s4092_s3 + $0x7d8] sm:$0xff] }
  0xda   :  { %2086 = vmatmul.msk.f32.gmra.mxu2 %vm440_vm1, %v3411_v56  ;;  %999 = vmatpush.msrb.mxu3 %v137_v4  ;;  %v271_v4 = vld [vmem:[%s4092_s3 + $0x730] sm:$0xff] }
  0xdb   :  { %2074 = vmatmul.msk.f32.gmra.mxu0 %vm440_vm1, %v3436_v1  ;;  %v3734_v40 = vpop.f32.mrf.mxu3 }
  0xdc   :  { %1000 = vmatpush.msrb.mxu3 %v116_v12  ;;  %v3662_v12 = vpop.f32.mrf.mxu2 }
  0xde   :  { %1001 = vmatpush.msrb.mxu3 %v95_v7  ;;  %v229_v7 = vld [vmem:[%s4092_s3 + $0x5e0] sm:$0xff] }
  0xdf   :  { %2101 = vmatmul.msk.f32.gmra.mxu1 %vm440_vm1, %v3459_v8  ;;  %v3610_v53 = vpop.f32.mrf.mxu0 }
  0xe0   :  { %1002 = vmatpush.msrb.mxu3 %v74_v9 }
  0xe2   :  { %2087 = vmatmul.msk.f32.gmra.mxu2 %vm440_vm1, %v3436_v1  ;;  %1003 = vmatpush.msrb.mxu3 %v53_v13  ;;  %v208_v13 = vld [vmem:[%s4092_s3 + $0x538] sm:$0xff] }
  0xe3   :  { %2075 = vmatmul.msk.f32.gmra.mxu0 %vm440_vm1, %v3459_v8  ;;  %1004 = vmatmul.f32.vlgmr.msrb.gmra.mxu3 %v3325_v24 }
  0xe4   :  { %2059 = vmatpush.msk.msra.mxu3 %vm444_vm0, %v434_v14  ;;  %v3686_v14 = vld [vmem:[%s4090_s1 + $0x58] sm:$0xff] }
  0xe5   :  { %v3628_v59 = vpop.f32.mrf.mxu1 }
  0xe6   :  { %1142 = vmatpush.msra.mxu3 %v413_v15  ;;  %v187_v15 = vld [vmem:[%s4092_s3 + $0x490] sm:$0xff] }
  0xe7   :  { %2102 = vmatmul.msk.f32.gmra.mxu1 %vm440_vm1, %v3486_v16 }
  0xe8   :  { %1143 = vmatpush.msra.mxu3 %v392_v18 }
  0xe9   :  { %v3640_v63 = vpop.f32.mrf.mxu0 }
  0xea   :  { %1148 = vmatpush.msrb.mxu3 %v372_v19  ;;  %2088 = vmatmul.msk.f32.gmra.mxu2 %vm440_vm1, %v3459_v8  ;;  %v166_v19 = vld [vmem:[%s4092_s3 + $0x3e8] sm:$0xff] }
  0xeb   :  { %2076 = vmatmul.msk.f32.gmra.mxu0 %vm440_vm1, %v3486_v16  ;;  %2060 = vmatmul.msk.f32.vlgmr.msra.gmra.mxu3 %vm440_vm1, %v3088_v11 }
  0xec   :  { %1149 = vmatpush.msrb.mxu3 %v351_v20 }
  0xee   :  { %1150 = vmatpush.msrb.mxu3 %v330_v22  ;;  %v145_v22 = vld [vmem:[%s4092_s3 + $0x340] sm:$0xff] }
  0xef   :  { %2103 = vmatmul.msk.f32.gmra.mxu1 %vm440_vm1, %v3518_v25  ;;  %v3664_v5 = vpop.f32.mrf.mxu1 }
  0xf0   :  { %1151 = vmatpush.msrb.mxu3 %v309_v23  ;;  %v124_v23 = vld [vmem:[%s4092_s3 + $0x298] sm:$0xff] }
  0xf1   :  { %v3691_v18 = vpop.f32.mrf.mxu2 }
  0xf2   :  { %1152 = vmatpush.msrb.mxu3 %v288_v27  ;;  %2089 = vmatmul.msk.f32.gmra.mxu2 %vm440_vm1, %v3486_v16 }
  0xf3   :  { %2077 = vmatmul.msk.f32.gmra.mxu0 %vm440_vm1, %v3518_v25 }
  0xf4   :  { %1153 = vmatpush.msrb.mxu3 %v267_v28  ;;  %v103_v28 = vld [vmem:[%s4092_s3 + $0x1f0] sm:$0xff] }
  0xf6   :  { %1154 = vmatpush.msrb.mxu3 %v246_v29  ;;  %v82_v29 = vld [vmem:[%s4092_s3 + $0x148] sm:$0xff] }
  0xf7   :  { %2104 = vmatmul.msk.f32.gmra.mxu1 %vm440_vm1, %v3545_v32 }
  0xf8   :  { %1155 = vmatpush.msrb.mxu3 %v225_v31 }
  0xfa   :  { %1156 = vmatpush.msrb.mxu3 %v204_v36  ;;  %2090 = vmatmul.msk.f32.gmra.mxu2 %vm440_vm1, %v3518_v25 }
  0xfb   :  { %2078 = vmatmul.msk.f32.gmra.mxu0 %vm440_vm1, %v3545_v32  ;;  %v3720_v31 = vpop.f32.mrf.mxu2 }
  0xfc   :  { %1157 = vmatpush.msrb.mxu3 %v183_v37  ;;  %v1443_v37 = vld [vmem:[#allocation2 + $0x88] sm:$0x1] }
  0xfe   :  { %1158 = vmatpush.msrb.mxu3 %v162_v38  ;;  %v1436_v38 = vld [vmem:[#allocation2 + $0x50] sm:$0xff] }
  0xff   :  { %2105 = vmatmul.msk.f32.gmra.mxu1 %vm440_vm1, %v3572_v43 }
 0x100   :  { %1159 = vmatpush.msrb.mxu3 %v141_v42  ;;  %v1429_v42 = vld [vmem:[#allocation2 + $0x18] sm:$0xff] }
 0x102   :  { %1160 = vmatpush.msrb.mxu3 %v120_v44  ;;  %2091 = vmatmul.msk.f32.gmra.mxu2 %vm440_vm1, %v3545_v32 }
 0x103   :  { %2079 = vmatmul.msk.f32.gmra.mxu0 %vm440_vm1, %v3572_v43 }
 0x104   :  { %1161 = vmatpush.msrb.mxu3 %v99_v46  ;;  %v3747_v46 = vpop.f32.mrf.mxu3 }
 0x106   :  { %1162 = vmatpush.msrb.mxu3 %v78_v47 }
 0x107   :  { %2106 = vmatmul.msk.f32.gmra.mxu1 %vm440_vm1, %v3597_v49 }
 0x108   :  { %1163 = vmatpush.msrb.mxu3 %v57_v48  ;;  %v3676_v9 = vpop.f32.mrf.mxu0 }
 0x109   :  { %1164 = vmatmul.f32.vlgmr.msrb.gmra.mxu3 %v3325_v24 }
 0x10a   :  { %2067 = vmatpush.msk.msra.mxu3 %vm444_vm0, %v438_v51  ;;  %2092 = vmatmul.msk.f32.gmra.mxu2 %vm440_vm1, %v3572_v43 }
 0x10b   :  { %2080 = vmatmul.msk.f32.gmra.mxu0 %vm440_vm1, %v3597_v49 }
 0x10c   :  { %1302 = vmatpush.msra.mxu3 %v417_v52 }
 0x10e   :  { %1303 = vmatpush.msra.mxu3 %v396_v54  ;;  %v3698_v20 = vpop.f32.mrf.mxu1 }
 0x10f   :  { %2107 = vmatmul.msk.f32.gmra.mxu1 %vm440_vm1, %v3626_v58 }
 0x110   :  { %1308 = vmatpush.msrb.mxu3 %v376_v55 }
 0x111   :  { %2068 = vmatmul.msk.f32.vlgmr.msra.gmra.mxu3 %vm440_vm1, %v3088_v11  ;;  %v3657_v11 = vld [vmem:[%s4090_s1 + $0x50] sm:$0xff] }
 0x112   :  { %1309 = vmatpush.msrb.mxu3 %v355_v60  ;;  %2093 = vmatmul.msk.f32.gmra.mxu2 %vm440_vm1, %v3597_v49  ;;  %v3710_v27 = vpop.f32.mrf.mxu0 }
 0x113   :  { %2081 = vmatmul.msk.f32.gmra.mxu0 %vm440_vm1, %v3626_v58 }
 0x114   :  { %1310 = vmatpush.msrb.mxu3 %v334_v62  ;;  %v3781_v62 = vld [vmem:[%s4091_s2 + $0x8] sm:$0xff] }
 0x116   :  { %1311 = vmatpush.msrb.mxu3 %v313_v0 }
 0x117   :  { %2108 = vmatmul.msk.f32.gmra.mxu1 %vm440_vm1, %v3657_v11 }
 0x118   :  { %1312 = vmatpush.msrb.mxu3 %v292_v3 }
 0x119   :  { %v3727_v36 = vpop.f32.mrf.mxu1 }
 0x11a   :  { %1313 = vmatpush.msrb.mxu3 %v271_v4  ;;  %2094 = vmatmul.msk.f32.gmra.mxu2 %vm440_vm1, %v3626_v58 }
 0x11b   :  { %2082 = vmatmul.msk.f32.gmra.mxu0 %vm440_vm1, %v3657_v11  ;;  %v3739_v44 = vpop.f32.mrf.mxu2 }
 0x11c   :  { %1314 = vmatpush.msrb.mxu3 %v250_v6  ;;  %v1360_v6 = vperm.slane %v3781_v62, 1 }
 0x11e   :  { %1315 = vmatpush.msrb.mxu3 %v229_v7 }
 0x11f   :  { %2109 = vmatmul.msk.f32.gmra.mxu1 %vm440_vm1, %v3686_v14 }
 0x120   :  { %1316 = vmatpush.msrb.mxu3 %v208_v13 }
 0x122   :  { %1317 = vmatpush.msrb.mxu3 %v187_v15  ;;  %2095 = vmatmul.msk.f32.gmra.mxu2 %vm440_vm1, %v3657_v11 }
 0x123   :  { %2083 = vmatmul.msk.f32.gmra.mxu0 %vm440_vm1, %v3686_v14  ;;  %v3764_v52 = vpop.f32.mrf.mxu3 }
 0x124   :  { %1318 = vmatpush.msrb.mxu3 %v166_v19 }
 0x125   :  { %v1085_v48 = vpop.f32.mrf.mxu2 }
 0x126   :  { %1319 = vmatpush.msrb.mxu3 %v145_v22 }
 0x127   :  { %2150 = vmatmul.msk.f32.vlgmr.msra.gmra.mxu1 %vm440_vm1, %v3383_v45 }
 0x128   :  { %1320 = vmatpush.msrb.mxu3 %v124_v23 }
 0x12a   :  { %1321 = vmatpush.msrb.mxu3 %v103_v28  ;;  %2096 = vmatmul.msk.f32.gmra.mxu2 %vm440_vm1, %v3686_v14 }
 0x12b   :  { %2124 = vmatmul.msk.f32.vlgmr.msra.gmra.mxu0 %vm440_vm1, %v3383_v45 }
 0x12c   :  { %1322 = vmatpush.msrb.mxu3 %v82_v29  ;;  %v826_v29 = vadd.f32 %v3547_v35, %v3599_v50 }
 0x12d   :  { %v3732_v39 = vpop.f32.mrf.mxu0 }
 0x12e   :  { %1323 = vmatpush.msrb.mxu3 %v61_v33 }
 0x12f   :  { %1324 = vmatmul.f32.vlgmr.msrb.gmra.mxu3 %v3325_v24  ;;  %2151 = vmatmul.msk.f32.gmra.mxu1 %vm440_vm1, %v3411_v56 }
 0x130   :  { %2110 = vmatpush.msk.msra.mxu3 %vm444_vm0, %v1443_v37 }
 0x132   :  { %1677 = vmatpush.msra.mxu3 %v1436_v38  ;;  %2137 = vmatmul.msk.f32.vlgmr.msrb.gmra.mxu2 %vm440_vm1, %v3383_v45  ;;  %v1106_v38 = vadd.f32 %v3698_v20, %v1085_v48 }
 0x133   :  { %2125 = vmatmul.msk.f32.gmra.mxu0 %vm440_vm1, %v3411_v56  ;;  %v1265_v24 = vpop.f32.mrf.mxu1 }
 0x134   :  { %1678 = vmatpush.msra.mxu3 %v1429_v42  ;;  %v1365_v42 = vperm.slane %v3781_v62, 6 }
 0x136   :  { %v1205_v47 = vpop.f32.mrf.mxu0 }
 0x137   :  { %2111 = vmatmul.msk.f32.vlgmr.msra.gmra.mxu3 %vm440_vm1, %v3383_v45  ;;  %2152 = vmatmul.msk.f32.gmra.mxu1 %vm440_vm1, %v3436_v1  ;;  %v3762_v45 = vld [vmem:[%s4091_s2] sm:$0xff] }
 0x138   :  { %v1353_v55 = vperm.slane %v3762_v45, 2  ;;  %v1358_v33 = vperm.slane %v3762_v45, 7  ;;  %v1351_v37 = vperm.slane %v3762_v45, 0 }
 0x13a   :  { %2138 = vmatmul.msk.f32.gmra.mxu2 %vm440_vm1, %v3411_v56  ;;  %v3823_v35 = vadd.f32 %v1358_v33, %v826_v29 }
 0x13b   :  { %2126 = vmatmul.msk.f32.gmra.mxu0 %vm440_vm1, %v3436_v1 }
 0x13c   :  { %v3755_v51 = vpop.f32.mrf.mxu1 }
 0x13e   :  { %v3766_v54 = vpop.f32.mrf.mxu0 }
 0x13f   :  { %2112 = vmatmul.msk.f32.gmra.mxu3 %vm440_vm1, %v3411_v56  ;;  %2153 = vmatmul.msk.f32.gmra.mxu1 %vm440_vm1, %v3459_v8  ;;  %v3776_v56 = vadd.f32 %v1353_v55, %v3353_v34 }
 0x142   :  { %2139 = vmatmul.msk.f32.gmra.mxu2 %vm440_vm1, %v3436_v1 }
 0x143   :  { %2127 = vmatmul.msk.f32.gmra.mxu0 %vm440_vm1, %v3459_v8  ;;  %v1225_v60 = vpop.f32.mrf.mxu2 }
 0x144   :  { %v3783_v0 = vadd.f32 %v1225_v60, %v1205_v47  ;;  %v1627_v3 = vpop.f32.mrf.mxu1 }
 0x145   :  { %v1877_v4 = vmul.f32 %v1627_v3, %v3776_v56 }
 0x146   :  { %v885_v7 = vpop.f32.mrf.mxu3 }
 0x147   :  { %2113 = vmatmul.msk.f32.gmra.mxu3 %vm440_vm1, %v3436_v1  ;;  %v906_v34 = vadd.f32 %v3691_v18, %v885_v7  ;;  %v1521_v13 = vpop.f32.mrf.mxu0  ;;  %2154 = vmatmul.msk.f32.gmra.mxu1 %vm440_vm1, %v3486_v16 }
 0x149   :  { %v3792_v15 = vadd.f32 %v1360_v6, %v906_v34 }
 0x14a   :  { %2140 = vmatmul.msk.f32.gmra.mxu2 %vm440_vm1, %v3459_v8 }
 0x14b   :  { %2128 = vmatmul.msk.f32.gmra.mxu0 %vm440_vm1, %v3486_v16 }
 0x14c   :  { %v1245_v1 = vpop.f32.mrf.mxu2  ;;  %v1630_v19 = vpop.f32.mrf.mxu1 }
 0x14d   :  { %v3800_v22 = vadd.f32 %v1265_v24, %v1245_v1  ;;  %v1884_v18 = vmul.f32 %v1630_v19, %v3792_v15  ;;  %v866_v19 = vadd.f32 %v3610_v53, %v3577_v2 }
 0x14f   :  { %2114 = vmatmul.msk.f32.gmra.mxu3 %vm440_vm1, %v3459_v8  ;;  %v3803_v23 = vadd.f32 %v1884_v18, %v1877_v4  ;;  %2155 = vmatmul.msk.f32.gmra.mxu1 %vm440_vm1, %v3518_v25  ;;  %v546_v8 = vadd.f32 %v3464_v10, %v3488_v17  ;;  %v3829_v10 = vadd.f32 %v1365_v42, %v1106_v38  ;;  %v1359_v18 = vperm.slane %v3781_v62, 0 }
 0x150   :  { %v1524_v28 = vpop.f32.mrf.mxu0 }
 0x151   :  { %v3827_v55 = vadd.f32 %v1351_v37, %v546_v8  ;;  %v1882_v17 = vmul.f32 %v1524_v28, %v3823_v35  ;;  %v1352_v28 = vperm.slane %v3762_v45, 1  ;;  %v3871_v8 = vadd.f32 %v1359_v18, %v866_v19 }
 0x152   :  { %2141 = vmatmul.msk.f32.gmra.mxu2 %vm440_vm1, %v3486_v16  ;;  %v1366_v37 = vperm.slane %v3781_v62, 7 }
 0x153   :  { %2129 = vmatmul.msk.f32.gmra.mxu0 %vm440_vm1, %v3518_v25  ;;  %v1875_v20 = vmul.f32 %v1521_v13, %v3827_v55 }
 0x154   :  { %v3819_v47 = vpop.f32.mrf.mxu1 }
 0x155   :  { %v1574_v24 = vpop.f32.mrf.mxu2 }
 0x157   :  { %2115 = vmatmul.msk.f32.gmra.mxu3 %vm440_vm1, %v3486_v16  ;;  %2156 = vmatmul.msk.f32.gmra.mxu1 %vm440_vm1, %v3545_v32  ;;  %v1889_v16 = vadd.f32 %v1882_v17, %v1875_v20 }
 0x158   :  { %v1527_v50 = vpop.f32.mrf.mxu0 }
 0x159   :  { %v1896_v48 = vmul.f32 %v1527_v50, %v3829_v10 }
 0x15a   :  { %2142 = vmatmul.msk.f32.gmra.mxu2 %vm440_vm1, %v3518_v25 }
 0x15b   :  { %2130 = vmatmul.msk.f32.gmra.mxu0 %vm440_vm1, %v3545_v32  ;;  %v1903_v4 = vadd.f32 %v1896_v48, %v1889_v16 }
 0x15c   :  { %v3838_v3 = vpop.f32.mrf.mxu1 }
 0x15d   :  { %v1577_v60 = vpop.f32.mrf.mxu2 }
 0x15f   :  { %2116 = vmatmul.msk.f32.gmra.mxu3 %vm440_vm1, %v3518_v25  ;;  %2157 = vmatmul.msk.f32.gmra.mxu1 %vm440_vm1, %v3572_v43 }
 0x160   :  { %v1530_v6 = vpop.f32.mrf.mxu0 }
 0x161   :  { %v1910_v7 = vadd.f32 %v1903_v4, %v1530_v6 }
 0x162   :  { %2143 = vmatmul.msk.f32.gmra.mxu2 %vm440_vm1, %v3545_v32 }
 0x163   :  { %1917 = vst [vmem:[%s4094_s5] sm:$0xff] %v1910_v7  ;;  %2131 = vmatmul.msk.f32.gmra.mxu0 %vm440_vm1, %v3572_v43 }
 0x164   :  { %v3851_v13 = vpop.f32.mrf.mxu1 }
 0x165   :  { %v1580_v34 = vpop.f32.mrf.mxu2 }
 0x166   :  { %v3855_v25 = vpop.f32.mrf.mxu3 }
 0x167   :  { %2117 = vmatmul.msk.f32.gmra.mxu3 %vm440_vm1, %v3545_v32  ;;  %2158 = vmatmul.msk.f32.gmra.mxu1 %vm440_vm1, %v3597_v49  ;;  %v586_v32 = vadd.f32 %v3235_v57, %v3633_v61  ;;  %v1883_v57 = vmul.f32 %v1577_v60, %v3871_v8 }
 0x168   :  { %v1533_v1 = vpop.f32.mrf.mxu0 }
 0x169   :  { %v3876_v38 = vadd.f32 %v1352_v28, %v586_v32  ;;  %v1924_v4 = vmul.f32 %v1533_v1, %v3827_v55 }
 0x16a   :  { %2144 = vmatmul.msk.f32.gmra.mxu2 %vm440_vm1, %v3572_v43 }
 0x16b   :  { %2132 = vmatmul.msk.f32.gmra.mxu0 %vm440_vm1, %v3597_v49 }
 0x16c   :  { %v1642_v33 = vpop.f32.mrf.mxu1 }
 0x16d   :  { %v1583_v29 = vpop.f32.mrf.mxu2 }
 0x16e   :  { %v1145_v2 = vpop.f32.mrf.mxu3 }
 0x16f   :  { %2118 = vmatmul.msk.f32.gmra.mxu3 %vm440_vm1, %v3572_v43  ;;  %2159 = vmatmul.msk.f32.gmra.mxu1 %vm440_vm1, %v3626_v58  ;;  %v1146_v61 = vadd.f32 %v1145_v2, %v3727_v36  ;;  %v1876_v43 = vmul.f32 %v1574_v24, %v3876_v38 }
 0x170   :  { %v1536_v53 = vpop.f32.mrf.mxu0 }
 0x171   :  { %v3883_v42 = vadd.f32 %v1366_v37, %v1146_v61  ;;  %v1890_v50 = vadd.f32 %v1883_v57, %v1876_v43  ;;  %v1931_v24 = vmul.f32 %v1536_v53, %v3823_v35  ;;  %v3921_v53 = vld [vmem:[%s4091_s2 + $0x10] sm:$0x1f]  ;;  %v1933_v43 = vmul.f32 %v1642_v33, %v3792_v15 }
 0x172   :  { %2145 = vmatmul.msk.f32.gmra.mxu2 %vm440_vm1, %v3597_v49  ;;  %v1367_v61 = vperm.slane %v3921_v53, 0 }
 0x173   :  { %2133 = vmatmul.msk.f32.gmra.mxu0 %vm440_vm1, %v3626_v58  ;;  %v1897_v17 = vmul.f32 %v1580_v34, %v3883_v42 }
 0x174   :  { %v1645_v48 = vpop.f32.mrf.mxu1 }
 0x175   :  { %v1586_v20 = vpop.f32.mrf.mxu2  ;;  %v1904_v16 = vadd.f32 %v1897_v17, %v1890_v50 }
 0x177   :  { %2119 = vmatmul.msk.f32.gmra.mxu3 %vm440_vm1, %v3597_v49  ;;  %2160 = vmatmul.msk.f32.gmra.mxu1 %vm440_vm1, %v3657_v11  ;;  %v1911_v60 = vadd.f32 %v1904_v16, %v1583_v29  ;;  %v1938_v49 = vadd.f32 %v1931_v24, %v1924_v4  ;;  %v1925_v29 = vmul.f32 %v1586_v20, %v3876_v38 }
 0x178   :  { %v1539_v36 = vpop.f32.mrf.mxu0 }
 0x179   :  { %1918 = vst [vmem:[%s4094_s5 + $0x8] sm:$0xff] %v1911_v60  ;;  %v1945_v6 = vmul.f32 %v1539_v36, %v3829_v10  ;;  %v1926_v36 = vmul.f32 %v3851_v13, %v3776_v56 }
 0x17a   :  { %2146 = vmatmul.msk.f32.gmra.mxu2 %vm440_vm1, %v3626_v58 }
 0x17b   :  { %2134 = vmatmul.msk.f32.gmra.mxu0 %vm440_vm1, %v3657_v11  ;;  %v1952_v19 = vadd.f32 %v1945_v6, %v1938_v49  ;;  %v1940_v4 = vadd.f32 %v1933_v43, %v1926_v36 }
 0x17c   :  { %v1648_v34 = vpop.f32.mrf.mxu1 }
 0x17d   :  { %v1589_v7 = vpop.f32.mrf.mxu2 }
 0x17f   :  { %2120 = vmatmul.msk.f32.gmra.mxu3 %vm440_vm1, %v3626_v58  ;;  %2161 = vmatmul.msk.f32.gmra.mxu1 %vm440_vm1, %v3686_v14  ;;  %v1932_v58 = vmul.f32 %v1589_v7, %v3871_v8 }
 0x180   :  { %v1542_v18 = vpop.f32.mrf.mxu0 }
 0x181   :  { %v1959_v1 = vadd.f32 %v1952_v19, %v1542_v18  ;;  %v1939_v57 = vadd.f32 %v1932_v58, %v1925_v29 }
 0x182   :  { %2147 = vmatmul.msk.f32.gmra.mxu2 %vm440_vm1, %v3657_v11 }
 0x183   :  { %2162 = vst [vmem:[%s4094_s5 + $0x38] sm:$0xff] %v1959_v1  ;;  %2135 = vmatmul.msk.f32.gmra.mxu0 %vm440_vm1, %v3686_v14 }
 0x184   :  { %v1651_v28 = vpop.f32.mrf.mxu1 }
 0x185   :  { %v1592_v32 = vpop.f32.mrf.mxu2 }
 0x186   :  { %v1946_v37 = vmul.f32 %v1592_v32, %v3883_v42 }
 0x187   :  { %2121 = vmatmul.msk.f32.gmra.mxu3 %vm440_vm1, %v3657_v11 }
 0x188   :  { %v1545_v2 = vpop.f32.mrf.mxu0  ;;  %v1953_v11 = vadd.f32 %v1946_v37, %v1939_v57 }
 0x189   :  { %v1974_v6 = vmul.f32 %v1545_v2, %v3827_v55 }
 0x18a   :  { %2148 = vmatmul.msk.f32.gmra.mxu2 %vm440_vm1, %v3686_v14 }
 0x18c   :  { %v1165_v50 = vpop.f32.mrf.mxu3  ;;  %v1654_v16 = vpop.f32.mrf.mxu1 }
 0x18d   :  { %v1186_v17 = vadd.f32 %v3732_v39, %v1165_v50  ;;  %v1595_v20 = vpop.f32.mrf.mxu2  ;;  %v1983_v55 = vmul.f32 %v1654_v16, %v3792_v15 }
 0x18e   :  { %v1960_v60 = vadd.f32 %v1953_v11, %v1595_v20 }
 0x18f   :  { %2122 = vmatmul.msk.f32.gmra.mxu3 %vm440_vm1, %v3686_v14  ;;  %v1409_v24 = vadd.f32 %v1367_v61, %v1186_v17 }
 0x190   :  { %2163 = vst [vmem:[%s4094_s5 + $0x40] sm:$0xff] %v1960_v60  ;;  %v1548_v33 = vpop.f32.mrf.mxu0 }
 0x191   :  { %v1898_v39 = vmul.f32 %v3819_v47, %v1409_v24  ;;  %v1947_v49 = vmul.f32 %v1645_v48, %v1409_v24  ;;  %v1981_v7 = vmul.f32 %v1548_v33, %v3823_v35  ;;  %v1364_v33 = vperm.slane %v3781_v62, 5 }
 0x193   :  { %v1905_v13 = vadd.f32 %v1898_v39, %v3803_v23  ;;  %v1954_v19 = vadd.f32 %v1947_v49, %v1940_v4  ;;  %v1988_v18 = vadd.f32 %v1981_v7, %v1974_v6  ;;  %v1976_v23 = vmul.f32 %v1651_v28, %v3776_v56 }
 0x194   :  { %v1657_v58 = vpop.f32.mrf.mxu1  ;;  %v1305_v17 = vpop.f32.mrf.mxu3  ;;  %v1355_v6 = vperm.slane %v3762_v45, 4  ;;  %v986_v39 = vadd.f32 %v3640_v63, %v3664_v5  ;;  %v1362_v49 = vperm.slane %v3781_v62, 3  ;;  %v786_v7 = vadd.f32 %v3564_v41, %v3764_v52 }
 0x195   :  { %v1912_v14 = vadd.f32 %v1905_v13, %v3838_v3  ;;  %v1961_v1 = vadd.f32 %v1954_v19, %v1648_v34  ;;  %v1598_v32 = vpop.f32.mrf.mxu2  ;;  %v1997_v35 = vmul.f32 %v1657_v58, %v1409_v24  ;;  %v1990_v3 = vadd.f32 %v1983_v55, %v1976_v23 }
 0x196   :  { %v1975_v43 = vmul.f32 %v1598_v32, %v3876_v38  ;;  %v1357_v13 = vperm.slane %v3762_v45, 6  ;;  %v3980_v63 = vadd.f32 %v1362_v49, %v986_v39  ;;  %v1026_v32 = vadd.f32 %v3676_v9, %v3855_v25 }
 0x197   :  { %1919 = vst [vmem:[%s4094_s5 + $0x10] sm:$0xff] %v1912_v14  ;;  %v2004_v37 = vadd.f32 %v1997_v35, %v1990_v3  ;;  %v1363_v58 = vperm.slane %v3781_v62, 4 }
 0x198   :  { %2164 = vst [vmem:[%s4094_s5 + $0x48] sm:$0xff] %v1961_v1  ;;  %v1551_v47 = vpop.f32.mrf.mxu0  ;;  %v3982_v5 = vadd.f32 %v1357_v13, %v786_v7  ;;  %v1356_v1 = vperm.slane %v3762_v45, 5 }
 0x199   :  { %v1995_v48 = vmul.f32 %v1551_v47, %v3829_v10  ;;  %v4003_v9 = vadd.f32 %v1363_v58, %v1026_v32 }
 0x19b   :  { %v2002_v34 = vadd.f32 %v1995_v48, %v1988_v18 }
 0x19c   :  { %v1660_v2 = vpop.f32.mrf.mxu1 }
 0x19d   :  { %v1601_v29 = vpop.f32.mrf.mxu2  ;;  %v2011_v57 = vadd.f32 %v2004_v37, %v1660_v2 }
 0x19e   :  { %v1982_v28 = vmul.f32 %v1601_v29, %v3871_v8  ;;  %v1066_v8 = vadd.f32 %v3739_v44, %v3710_v27  ;;  %v1371_v44 = vperm.slane %v3921_v53, 4 }
 0x19f   :  { %2171 = vst [vmem:[%s4094_s5 + $0x80] sm:$0xff] %v2011_v57 }
 0x1a0   :  { %v1554_v61 = vpop.f32.mrf.mxu0  ;;  %v1989_v20 = vadd.f32 %v1982_v28, %v1975_v43  ;;  %v3975_v19 = vadd.f32 %v1364_v33, %v1066_v8  ;;  %v946_v28 = vadd.f32 %v3628_v59, %v3720_v31  ;;  %v1368_v31 = vperm.slane %v3921_v53, 1 }
 0x1a1   :  { %v2009_v15 = vadd.f32 %v2002_v34, %v1554_v61 }
 0x1a3   :  { %2169 = vst [vmem:[%s4094_s5 + $0x70] sm:$0xff] %v2009_v15 }
 0x1a4   :  { %v1839_v10 = vpop.f32.mrf.mxu1 }
 0x1a5   :  { %v1604_v56 = vpop.f32.mrf.mxu2  ;;  %v1881_v23 = vmul.f32 %v1839_v10, %v3982_v5  ;;  %v1361_v10 = vperm.slane %v3781_v62, 2 }
 0x1a6   :  { %v1996_v50 = vmul.f32 %v1604_v56, %v3883_v42  ;;  %v706_v42 = vadd.f32 %v3501_v21, %v3662_v12  ;;  %v1369_v21 = vperm.slane %v3921_v53, 2 }
 0x1a7   :  { %v4021_v59 = vadd.f32 %v1361_v10, %v946_v28 }
 0x1a8   :  { %v1733_v11 = vpop.f32.mrf.mxu0  ;;  %v2003_v16 = vadd.f32 %v1996_v50, %v1989_v20  ;;  %v3978_v18 = vadd.f32 %v1355_v6, %v706_v42  ;;  %v3994_v47 = vadd.f32 %v1369_v21, %v3800_v22 }
 0x1ac   :  { %v1842_v24 = vpop.f32.mrf.mxu1 }
 0x1ad   :  { %v1607_v36 = vpop.f32.mrf.mxu2  ;;  %v1888_v41 = vmul.f32 %v1842_v24, %v3975_v19  ;;  %v1370_v24 = vperm.slane %v3921_v53, 3 }
 0x1ae   :  { %v2010_v60 = vadd.f32 %v2003_v16, %v1607_v36  ;;  %v666_v16 = vadd.f32 %v3520_v26, %v3734_v40  ;;  %v1354_v36 = vperm.slane %v3762_v45, 3 }
 0x1b0   :  { %2170 = vst [vmem:[%s4094_s5 + $0x78] sm:$0xff] %v2010_v60  ;;  %v1736_v4 = vpop.f32.mrf.mxu0  ;;  %v1306_v60 = vadd.f32 %v1305_v17, %v3755_v51  ;;  %v4030_v51 = vadd.f32 %v1368_v31, %v3783_v0 }
 0x1b1   :  { %v1886_v35 = vmul.f32 %v1736_v4, %v3980_v63  ;;  %v4024_v4 = vadd.f32 %v1354_v36, %v666_v16 }
 0x1b2   :  { %v1325_v38 = vpop.f32.mrf.mxu3  ;;  %v4026_v8 = vadd.f32 %v1370_v24, %v1306_v60 }
 0x1b3   :  { %v1346_v27 = vadd.f32 %v3766_v54, %v1325_v38  ;;  %v746_v54 = vadd.f32 %v3537_v30, %v3747_v46  ;;  %v1879_v30 = vmul.f32 %v1733_v11, %v3978_v18  ;;  %v1895_v46 = vadd.f32 %v1888_v41, %v1881_v23 }
 0x1b4   :  { %v1845_v14 = vpop.f32.mrf.mxu1 }
 0x1b5   :  { %v1786_v12 = vpop.f32.mrf.mxu2  ;;  %v3985_v52 = vadd.f32 %v1371_v44, %v1346_v27  ;;  %v4001_v29 = vadd.f32 %v1356_v1, %v746_v54  ;;  %v1893_v25 = vadd.f32 %v1886_v35, %v1879_v30 }
 0x1b7   :  { %v1902_v48 = vmul.f32 %v1845_v14, %v3985_v52  ;;  %v1880_v2 = vmul.f32 %v1786_v12, %v4001_v29 }
 0x1b8   :  { %v1739_v55 = vpop.f32.mrf.mxu0 }
 0x1b9   :  { %v1900_v34 = vmul.f32 %v1739_v55, %v3994_v47  ;;  %v1909_v22 = vadd.f32 %v1902_v48, %v1895_v46 }
 0x1ba   :  { %v1680_v3 = vpop.f32.mrf.mxu3 }
 0x1bb   :  { %v1907_v56 = vadd.f32 %v1900_v34, %v1893_v25  ;;  %v1878_v45 = vmul.f32 %v1680_v3, %v4024_v4 }
 0x1bc   :  { %v1848_v61 = vpop.f32.mrf.mxu1 }
 0x1bd   :  { %v1789_v37 = vpop.f32.mrf.mxu2  ;;  %v1916_v15 = vadd.f32 %v1909_v22, %v1848_v61 }
 0x1be   :  { %v1887_v57 = vmul.f32 %v1789_v37, %v4003_v9 }
 0x1bf   :  { %1923 = vst [vmem:[%s4094_s5 + $0x30] sm:$0xff] %v1916_v15 }
 0x1c0   :  { %v1894_v43 = vadd.f32 %v1887_v57, %v1880_v2  ;;  %v1742_v50 = vpop.f32.mrf.mxu0 }
 0x1c1   :  { %v1914_v20 = vadd.f32 %v1907_v56, %v1742_v50 }
 0x1c2   :  { %v1683_v11 = vpop.f32.mrf.mxu3 }
 0x1c3   :  { %1921 = vst [vmem:[%s4094_s5 + $0x20] sm:$0xff] %v1914_v20  ;;  %v1885_v26 = vmul.f32 %v1683_v11, %v4021_v59 }
 0x1c4   :  { %v1851_v40 = vpop.f32.mrf.mxu1 }
 0x1c5   :  { %v1792_v62 = vpop.f32.mrf.mxu2  ;;  %v1892_v42 = vadd.f32 %v1885_v26, %v1878_v45  ;;  %v1930_v54 = vmul.f32 %v1851_v40, %v3982_v5 }
 0x1c6   :  { %v1901_v17 = vmul.f32 %v1792_v62, %v4026_v8 }
 0x1c8   :  { %v1745_v33 = vpop.f32.mrf.mxu0  ;;  %v1908_v6 = vadd.f32 %v1901_v17, %v1894_v43 }
 0x1c9   :  { %v1928_v55 = vmul.f32 %v1745_v33, %v3978_v18 }
 0x1ca   :  { %v1686_v38 = vpop.f32.mrf.mxu3 }
 0x1cb   :  { %v1899_v53 = vmul.f32 %v1686_v38, %v4030_v51 }
 0x1cc   :  { %v1854_v13 = vpop.f32.mrf.mxu1 }
 0x1cd   :  { %v1906_v39 = vadd.f32 %v1899_v53, %v1892_v42  ;;  %v1795_v49 = vpop.f32.mrf.mxu2  ;;  %v1937_v14 = vmul.f32 %v1854_v13, %v3975_v19 }
 0x1ce   :  { %v1915_v7 = vadd.f32 %v1908_v6, %v1795_v49 }
 0x1cf   :  { %v1944_v23 = vadd.f32 %v1937_v14, %v1930_v54 }
 0x1d0   :  { %1922 = vst [vmem:[%s4094_s5 + $0x28] sm:$0xff] %v1915_v7  ;;  %v1748_v0 = vpop.f32.mrf.mxu0 }
 0x1d1   :  { %v1935_v1 = vmul.f32 %v1748_v0, %v3980_v63 }
 0x1d2   :  { %v1689_v27 = vpop.f32.mrf.mxu3 }
 0x1d3   :  { %v1913_v44 = vadd.f32 %v1906_v39, %v1689_v27  ;;  %v1942_v48 = vadd.f32 %v1935_v1, %v1928_v55 }
 0x1d4   :  { %v1857_v12 = vpop.f32.mrf.mxu1 }
 0x1d5   :  { %1920 = vst [vmem:[%s4094_s5 + $0x18] sm:$0xff] %v1913_v44  ;;  %v1798_v21 = vpop.f32.mrf.mxu2  ;;  %v1951_v32 = vmul.f32 %v1857_v12, %v3985_v52 }
 0x1d6   :  { %v1929_v46 = vmul.f32 %v1798_v21, %v4001_v29 }
 0x1d7   :  { %v1958_v30 = vadd.f32 %v1951_v32, %v1944_v23 }
 0x1d8   :  { %v1751_v41 = vpop.f32.mrf.mxu0 }
 0x1d9   :  { %v1949_v35 = vmul.f32 %v1751_v41, %v3994_v47 }
 0x1da   :  { %v1692_v58 = vpop.f32.mrf.mxu3 }
 0x1db   :  { %v1956_v22 = vadd.f32 %v1949_v35, %v1942_v48  ;;  %v1927_v43 = vmul.f32 %v1692_v58, %v4024_v4 }
 0x1dc   :  { %v1860_v25 = vpop.f32.mrf.mxu1 }
 0x1dd   :  { %v1801_v3 = vpop.f32.mrf.mxu2  ;;  %v1965_v37 = vadd.f32 %v1958_v30, %v1860_v25 }
 0x1de   :  { %v1936_v34 = vmul.f32 %v1801_v3, %v4003_v9 }
 0x1df   :  { %2168 = vst [vmem:[%s4094_s5 + $0x68] sm:$0xff] %v1965_v37 }
 0x1e0   :  { %v1943_v2 = vadd.f32 %v1936_v34, %v1929_v46  ;;  %v1754_v57 = vpop.f32.mrf.mxu0 }
 0x1e1   :  { %v1963_v15 = vadd.f32 %v1956_v22, %v1754_v57 }
 0x1e2   :  { %v1695_v61 = vpop.f32.mrf.mxu3 }
 0x1e3   :  { %2166 = vst [vmem:[%s4094_s5 + $0x58] sm:$0xff] %v1963_v15  ;;  %v1934_v28 = vmul.f32 %v1695_v61, %v4021_v59 }
 0x1e4   :  { %v1863_v10 = vpop.f32.mrf.mxu1 }
 0x1e5   :  { %v1804_v56 = vpop.f32.mrf.mxu2  ;;  %v1941_v16 = vadd.f32 %v1934_v28, %v1927_v43  ;;  %v1980_v40 = vmul.f32 %v1863_v10, %v3982_v5 }
 0x1e6   :  { %v1950_v50 = vmul.f32 %v1804_v56, %v4026_v8 }
 0x1e8   :  { %v1757_v11 = vpop.f32.mrf.mxu0  ;;  %v1957_v60 = vadd.f32 %v1950_v50, %v1943_v2 }
 0x1e9   :  { %v1978_v33 = vmul.f32 %v1757_v11, %v3978_v18 }
 0x1ea   :  { %v1698_v20 = vpop.f32.mrf.mxu3 }
 0x1eb   :  { %v1948_v36 = vmul.f32 %v1698_v20, %v4030_v51 }
 0x1ec   :  { %v1866_v26 = vpop.f32.mrf.mxu1 }
 0x1ed   :  { %v1955_v24 = vadd.f32 %v1948_v36, %v1941_v16  ;;  %v1807_v31 = vpop.f32.mrf.mxu2  ;;  %v1987_v45 = vmul.f32 %v1866_v26, %v3975_v19 }
 0x1ee   :  { %v1964_v62 = vadd.f32 %v1957_v60, %v1807_v31 }
 0x1ef   :  { %v1994_v38 = vadd.f32 %v1987_v45, %v1980_v40 }
 0x1f0   :  { %2167 = vst [vmem:[%s4094_s5 + $0x60] sm:$0xff] %v1964_v62  ;;  %v1760_v17 = vpop.f32.mrf.mxu0 }
 0x1f1   :  { %v1985_v53 = vmul.f32 %v1760_v17, %v3980_v63 }
 0x1f2   :  { %v1701_v42 = vpop.f32.mrf.mxu3 }
 0x1f3   :  { %v1962_v6 = vadd.f32 %v1955_v24, %v1701_v42  ;;  %v1992_v39 = vadd.f32 %v1985_v53, %v1978_v33 }
 0x1f4   :  { %v1869_v49 = vpop.f32.mrf.mxu1 }
 0x1f5   :  { %2165 = vst [vmem:[%s4094_s5 + $0x50] sm:$0xff] %v1962_v6  ;;  %v1810_v5 = vpop.f32.mrf.mxu2  ;;  %v2001_v19 = vmul.f32 %v1869_v49, %v3985_v52 }
 0x1f6   :  { %v1979_v21 = vmul.f32 %v1810_v5, %v4001_v29 }
 0x1f7   :  { %v2008_v27 = vadd.f32 %v2001_v19, %v1994_v38 }
 0x1f8   :  { %v1763_v7 = vpop.f32.mrf.mxu0 }
 0x1f9   :  { %v1999_v0 = vmul.f32 %v1763_v7, %v3994_v47 }
 0x1fa   :  { %v1704_v13 = vpop.f32.mrf.mxu3 }
 0x1fb   :  { %v2006_v18 = vadd.f32 %v1999_v0, %v1992_v39  ;;  %v1977_v32 = vmul.f32 %v1704_v13, %v4024_v4 }
 0x1fc   :  { %v1872_v12 = vpop.f32.mrf.mxu1 }
 0x1fd   :  { %v1813_v44 = vpop.f32.mrf.mxu2  ;;  %v2015_v14 = vadd.f32 %v2008_v27, %v1872_v12 }
 0x1fe   :  { %v1986_v63 = vmul.f32 %v1813_v44, %v4003_v9 }
 0x1ff   :  { %2175 = vst [vmem:[%s4094_s5 + $0xa0] sm:$0xff] %v2015_v14 }
 0x200   :  { %v1993_v41 = vadd.f32 %v1986_v63, %v1979_v21  ;;  %v1766_v54 = vpop.f32.mrf.mxu0 }
 0x201   :  { %v2013_v1 = vadd.f32 %v2006_v18, %v1766_v54 }
 0x202   :  { %v1707_v52 = vpop.f32.mrf.mxu3 }
 0x203   :  { %v1984_v47 = vmul.f32 %v1707_v52, %v4021_v59  ;;  %2173 = vst [vmem:[%s4094_s5 + $0x90] sm:$0xff] %v2013_v1 }
 0x205   :  { %v1991_v29 = vadd.f32 %v1984_v47, %v1977_v32  ;;  %v1816_v9 = vpop.f32.mrf.mxu2 }
 0x206   :  { %v2000_v58 = vmul.f32 %v1816_v9, %v4026_v8 }
 0x208   :  { %v2007_v55 = vadd.f32 %v2000_v58, %v1993_v41 }
 0x20a   :  { %v1710_v23 = vpop.f32.mrf.mxu3 }
 0x20b   :  { %v1998_v35 = vmul.f32 %v1710_v23, %v4030_v51 }
 0x20d   :  { %v2005_v48 = vadd.f32 %v1998_v35, %v1991_v29  ;;  %v1819_v3 = vpop.f32.mrf.mxu2 }
 0x20e   :  { %v2014_v30 = vadd.f32 %v2007_v55, %v1819_v3 }
 0x210   :  { %2174 = vst [vmem:[%s4094_s5 + $0x98] sm:$0xff] %v2014_v30 }
 0x212   :  { %v1713_v59 = vpop.f32.mrf.mxu3 }
 0x213   :  { %v2012_v4 = vadd.f32 %v2005_v48, %v1713_v59 }
 0x215   :  { %2172 = vst [vmem:[%s4094_s5 + $0x88] sm:$0xff] %v2012_v4 }
 0x216   :  { %2028 = vsyncpa [#allocation3], 1 }

</bundles_post_ra>
